<compile_context>
chip_gen: v7x
topology: tpu7x:2x2x1
jax: 0.10.0
libtpu: 0.0.40
codegen_flags: <defaults>
</compile_context>

<pallas_src>
import functools
import math

import jax
import jax.numpy as jnp
from jax.experimental import pallas as pl
from jax.experimental.pallas import tpu as pltpu

SQRT_HALF = math.sqrt(0.5)


def _round_up(n, m):
    return -(-n // m) * m


# ------------------------------- Pallas kernel -------------------------------

def _gated_cnn_kernel(*refs, cfg, T, D, NB, P_FRONT, Trow):
    """One grid step = one batch element (sequence). The whole network (both directions, all
    residual blocks / conv layers) runs with activations resident in VMEM.

    refs = (x, mask, w0, b0, w1, b1, ..., out, hpad)
      x    : (T, D)          f32   -- time on sublanes, channels on lanes
      mask : (T, 1)          f32   -- broadcast to D lanes once in-kernel
      w_i  : (K*Din, 2*Dout) bf16  -- K conv taps stacked on the contraction dim,
                                      value/gate halves fused on the output dim
      b_i  : (1, 2*Dout)     f32
      out  : (T, NB*2*D)     f32   -- lane-dense [blk0: fwd|bwd, blk1: fwd|bwd, ...]
      hpad : (Trow, cmax)    f32 VMEM -- zero-padded activation buffer

    Correctness invariant: the pad rows [0, P_FRONT) and [P_FRONT+T, Trow) of hpad are zeroed
    once below and never written afterwards; every layer overwrites rows [P_FRONT, P_FRONT+T)
    columns [0, Din) before reading them.
    """
    x_ref, mask_ref = refs[0], refs[1]
    out_ref = refs[-2]
    hpad_ref = refs[-1]
    w_refs = refs[2:-2]
    cmax = hpad_ref.shape[1]

    x = x_ref[...]                                          # (T, D) f32
    # Lane-broadcast the (T, 1) mask to D lanes once; reused by every block of both directions.
    maskD = jnp.broadcast_to(mask_ref[...], (T, D))

    # Zero only the pad rows (not the whole buffer); 8-aligned full-width stores.
    hpad_ref[0:P_FRONT, :] = jnp.zeros((P_FRONT, cmax), jnp.float32)
    tail = Trow - (P_FRONT + T)
    if tail > 0:
        hpad_ref[P_FRONT + T:Trow, :] = jnp.zeros((tail, cmax), jnp.float32)

    outs = {"forward": [], "backward": []}
    for direction, blocks in cfg:                           # static python loop (2 directions)
        is_fwd = direction == "forward"
        out = x
        for block in blocks:                                # static: residual blocks
            block_in = out * maskD                          # masked_fill(~mask, 0) folded in
            h = block_in
            n_layers = len(block)
            for li, lc in enumerate(block):                 # static: conv layers in the block
                K, dil, Din, Dout, wi, pad = (
                    lc["K"], lc["d"], lc["Din"], lc["Dout"], lc["wi"], lc["pad"])

                # Single staging copy per layer: h into the padded buffer (8-aligned rows).
                hpad_ref[P_FRONT:P_FRONT + T, 0:Din] = h

                # K tap matmuls on shifted views of hpad; bf16 operands, f32 accumulation.
                acc = jnp.zeros((T, 2 * Dout), jnp.float32)
                for j in range(K):
                    off = (P_FRONT - pad + j * dil) if is_fwd else (P_FRONT + j * dil)
                    tap = hpad_ref[off:off + T, 0:Din].astype(jnp.bfloat16)
                    w_tap = w_refs[wi][j * Din:(j + 1) * Din, :]      # (Din, 2*Dout) bf16
                    acc = acc + jnp.dot(tap, w_tap, preferred_element_type=jnp.float32)
                acc = acc + w_refs[wi + 1][...]                       # bias (1, 2*Dout) f32

                # GLU + (on the last layer of the block) residual * sqrt(0.5), all in f32.
                # TODO(synk): for production configs align Dout to 128 lanes so the value/gate
                #             split stays lane-aligned (Dout=32 here needs a small relayout).
                glu = acc[:, 0:Dout] * jax.nn.sigmoid(acc[:, Dout:2 * Dout])
                h = glu if li < n_layers - 1 else (glu + block_in) * SQRT_HALF

            out = h
            outs[direction].append(out)

    # One lane-dense full-width store of all block outputs for this sequence.
    # TODO(synk): for large D / deep configs keep block outputs in ping-pong VMEM scratch
    #             instead of long-lived traced values to bound vreg live ranges.
    cols = []
    for bi in range(NB):
        cols.append(outs["forward"][bi])
        cols.append(outs["backward"][bi])
    out_ref[...] = jnp.concatenate(cols, axis=1).astype(out_ref.dtype)


# --------------------------- parameters (synthetic) ---------------------------

def init_params(key, input_size, layers):
    """Mirrors GatedCnnEncoder.__init__: forward + backward residual blocks.
    Conv weight std = sqrt(4*(1-dropout)/(K*in_dim)) with dropout=0, bias zeros.
    Weight kept fused as (K, C_in, 2*C_out): [..., :C_out] -> GLU value, [..., C_out:] -> gate."""
    params = {"forward": [], "backward": []}
    for direction in ("forward", "backward"):
        blocks = []
        for block_cfg in layers:
            last_dim = input_size
            convs = []
            for layer in block_cfg:
                if len(layer) == 2:
                    K, out_dim = layer
                    dil = 1
                else:
                    K, out_dim, dil = layer
                    assert K == 2, "only kernel=2 supported for dilated layers"
                std = math.sqrt(4.0 / (K * last_dim))
                key, k1 = jax.random.split(key)
                w = jax.random.normal(k1, (K, last_dim, 2 * out_dim), jnp.float32) * std
                b = jnp.zeros((1, 2 * out_dim), jnp.float32)
                convs.append((w, b, K, dil))
                last_dim = out_dim
            assert last_dim == input_size
            blocks.append(convs)
        params[direction] = blocks
    return params


# ------------------------------- forward pass ---------------------------------

def gated_cnn_lm_forward(params, x, mask):
    """x: (B, T, D) float32, mask: (B, T) bool.
    Returns (num_blocks, B, T, 2*D) — stacked per-block [forward; backward] features."""
    B, T, D = x.shape
    NB = len(params["forward"])
    assert T % 8 == 0, "demo/wrapper assumes T is a multiple of 8 sublanes"

    flat, cfg = [], []
    maxpad, cmax = 1, D
    for direction in ("forward", "backward"):
        dblocks = []
        for block in params[direction]:
            lcfg = []
            for (w, b, K, dil) in block:
                Din = w.shape[1]
                Dout = w.shape[2] // 2
                pad = (K - 1) * dil
                wi = len(flat)
                # Taps stacked on the contraction dim, value/gate fused; bf16 for the MXU.
                flat.append(w.reshape(K * Din, 2 * Dout).astype(jnp.bfloat16))
                flat.append(b)                               # bias stays f32
                maxpad = max(maxpad, pad)
                cmax = max(cmax, Din)
                lcfg.append(dict(K=K, d=dil, Din=Din, Dout=Dout, wi=wi, pad=pad))
            dblocks.append(lcfg)
        cfg.append((direction, dblocks))

    # 8-aligned padded-buffer geometry: h lives at rows [P_FRONT, P_FRONT+T).
    P_FRONT = _round_up(maxpad, 8)
    Trow = _round_up(P_FRONT + T + maxpad, 8)

    x2 = x.reshape(B * T, D)
    m2 = mask.astype(x.dtype).reshape(B * T, 1)              # (B*T, 1): broadcast in-kernel

    kernel = functools.partial(_gated_cnn_kernel, cfg=tuple(cfg), T=T, D=D, NB=NB,
                               P_FRONT=P_FRONT, Trow=Trow)

    out2 = pl.pallas_call(
        kernel,
        out_shape=jax.ShapeDtypeStruct((B * T, NB * 2 * D), x.dtype),
        grid=(B,),
        in_specs=[pl.BlockSpec((T, D), lambda i: (i, 0)),         # one sequence per grid step
                  pl.BlockSpec((T, 1), lambda i: (i, 0))]
                 + [pl.BlockSpec(a.shape, lambda i: (0, 0)) for a in flat],  # resident weights
        out_specs=pl.BlockSpec((T, NB * 2 * D), lambda i: (i, 0)),
        scratch_shapes=[pltpu.VMEM((Trow, cmax), jnp.float32)],   # padded activation buffer
        compiler_params=pltpu.CompilerParams(
            dimension_semantics=("parallel",),                    # shard grid across TCs (v7x)
            vmem_limit_bytes=32 * 1024 * 1024),                   # explicit; raise for big tiles
    )(x2, m2, *flat)

    # (B*T, NB*2*D) -> (NB, B, T, 2*D): cheap layout plumbing outside the kernel.
    return out2.reshape(B, T, NB, 2 * D).transpose(2, 0, 1, 3)


# ----------------------------- pure-JAX reference ------------------------------

def ref_forward(params, x, mask, matmul_dtype=jnp.float32):
    B, T, D = x.shape
    maskf = mask.astype(x.dtype)[:, :, None]
    outs = [[], []]
    for di, direction in enumerate(("forward", "backward")):
        out = x
        for convs in params[direction]:
            block_in = out * maskf
            h = block_in
            n = len(convs)
            for li, (w, b, K, d) in enumerate(convs):
                Dout = w.shape[2] // 2
                pad = (K - 1) * d
                if direction == "forward":
                    hp = jnp.pad(h, ((0, 0), (pad, 0), (0, 0)))
                else:
                    hp = jnp.pad(h, ((0, 0), (0, pad), (0, 0)))
                acc = jnp.zeros((B, T, 2 * Dout), jnp.float32)
                for j in range(K):
                    xj = jax.lax.dynamic_slice_in_dim(hp, j * d, T, axis=1)
                    acc = acc + jnp.einsum("btc,cd->btd",
                                           xj.astype(matmul_dtype),
                                           w[j].astype(matmul_dtype),
                                           preferred_element_type=jnp.float32)
                acc = acc + b
                glu = acc[..., :Dout] * jax.nn.sigmoid(acc[..., Dout:])
                h = glu if li < n - 1 else (glu + block_in) * SQRT_HALF
            out = h
            outs[di].append(out)
    return jnp.stack(
        [jnp.concatenate([f, bw], axis=-1) for f, bw in zip(outs[0], outs[1])], axis=0
    )


# ------------------------------------- main ------------------------------------

if __name__ == "__main__":
    key = jax.random.PRNGKey(0)
    B, T, D = 2, 16, 32
    # layers: list of residual blocks; each conv layer is [K, out_dim] or [2, out_dim, dilation]
    layers = [[[2, 32]], [[2, 32, 2], [3, 32]]]

    kx, kp = jax.random.split(key)
    x = jax.random.normal(kx, (B, T, D), jnp.float32)
    lengths = jnp.array([T, T - 5], dtype=jnp.int32)
    mask = jnp.arange(T)[None, :] < lengths[:, None]     # (B, T) bool

    params = init_params(kp, D, layers)

    out = gated_cnn_lm_forward(params, x, mask)
    out = jax.block_until_ready(out)
    assert out.shape == (len(layers), B, T, 2 * D), out.shape

    # Tight check vs. a reference using the same bf16 matmul operands as the kernel's MXU path.
    ref_bf16 = ref_forward(params, x, mask, matmul_dtype=jnp.bfloat16)
    err_b = float(jnp.max(jnp.abs(out - ref_bf16)))
    assert jnp.allclose(out, ref_bf16, atol=1e-3, rtol=1e-3), err_b
    # Loose sanity check vs. the exact-f32 torch-semantics reference (bf16 MXU operands expected
    # to deviate at the ~1e-2 level).
    ref_f32 = ref_forward(params, x, mask, matmul_dtype=jnp.float32)
    err_f = float(jnp.max(jnp.abs(out - ref_f32)))
    assert jnp.allclose(out, ref_f32, atol=1e-1, rtol=1e-1), err_f

    print("KERNEL_OK")
</pallas_src>

<mosaic_0001>
module attributes {stable_mosaic.version = 11 : i64} {
  func.func @_gated_cnn_kernel(%arg0: i32, %arg1: memref<16x32xf32, #tpu.memory_space<vmem>>, %arg2: memref<16x1xf32, #tpu.memory_space<vmem>>, %arg3: memref<64x64xbf16, #tpu.memory_space<vmem>>, %arg4: memref<1x64xf32, #tpu.memory_space<vmem>>, %arg5: memref<64x64xbf16, #tpu.memory_space<vmem>>, %arg6: memref<1x64xf32, #tpu.memory_space<vmem>>, %arg7: memref<96x64xbf16, #tpu.memory_space<vmem>>, %arg8: memref<1x64xf32, #tpu.memory_space<vmem>>, %arg9: memref<64x64xbf16, #tpu.memory_space<vmem>>, %arg10: memref<1x64xf32, #tpu.memory_space<vmem>>, %arg11: memref<64x64xbf16, #tpu.memory_space<vmem>>, %arg12: memref<1x64xf32, #tpu.memory_space<vmem>>, %arg13: memref<96x64xbf16, #tpu.memory_space<vmem>>, %arg14: memref<1x64xf32, #tpu.memory_space<vmem>>, %arg15: memref<16x128xf32, #tpu.memory_space<vmem>>, %arg16: memref<32x32xf32, #tpu.memory_space<vmem>>) attributes {dimension_semantics = [#tpu.dimension_semantics<parallel>], iteration_bounds = array<i64: 2>, scalar_prefetch = 0 : i64, scratch_operands = 1 : i64, tpu.core_type = #tpu.core_type<tc>, window_params = [{transform_indices = @transform_0, window_bounds = array<i64: 16, 32>}, {transform_indices = @transform_1, window_bounds = array<i64: 16, 1>}, {pipeline_mode = #tpu.pipeline_mode<synchronous>, transform_indices = @transform_2, window_bounds = array<i64: 64, 64>}, {pipeline_mode = #tpu.pipeline_mode<synchronous>, transform_indices = @transform_3, window_bounds = array<i64: 1, 64>}, {pipeline_mode = #tpu.pipeline_mode<synchronous>, transform_indices = @transform_4, window_bounds = array<i64: 64, 64>}, {pipeline_mode = #tpu.pipeline_mode<synchronous>, transform_indices = @transform_5, window_bounds = array<i64: 1, 64>}, {pipeline_mode = #tpu.pipeline_mode<synchronous>, transform_indices = @transform_6, window_bounds = array<i64: 96, 64>}, {pipeline_mode = #tpu.pipeline_mode<synchronous>, transform_indices = @transform_7, window_bounds = array<i64: 1, 64>}, {pipeline_mode = #tpu.pipeline_mode<synchronous>, transform_indices = @transform_8, window_bounds = array<i64: 64, 64>}, {pipeline_mode = #tpu.pipeline_mode<synchronous>, transform_indices = @transform_9, window_bounds = array<i64: 1, 64>}, {pipeline_mode = #tpu.pipeline_mode<synchronous>, transform_indices = @transform_10, window_bounds = array<i64: 64, 64>}, {pipeline_mode = #tpu.pipeline_mode<synchronous>, transform_indices = @transform_11, window_bounds = array<i64: 1, 64>}, {pipeline_mode = #tpu.pipeline_mode<synchronous>, transform_indices = @transform_12, window_bounds = array<i64: 96, 64>}, {pipeline_mode = #tpu.pipeline_mode<synchronous>, transform_indices = @transform_13, window_bounds = array<i64: 1, 64>}, {transform_indices = @transform_14, window_bounds = array<i64: 16, 128>}]} {
    %c0 = arith.constant 0 : index
    %c0_0 = arith.constant 0 : index
    %0 = vector.load %arg1[%c0, %c0_0] : memref<16x32xf32, #tpu.memory_space<vmem>>, vector<16x32xf32>
    %c0_1 = arith.constant 0 : index
    %c0_2 = arith.constant 0 : index
    %1 = vector.load %arg2[%c0_1, %c0_2] : memref<16x1xf32, #tpu.memory_space<vmem>>, vector<16x1xf32>
    %2 = vector.shape_cast %1 : vector<16x1xf32> to vector<16x1xf32>
    %3 = vector.broadcast %2 : vector<16x1xf32> to vector<16x32xf32>
    %cst = arith.constant 0.000000e+00 : f32
    %4 = vector.broadcast %cst : f32 to vector<8x32xf32>
    %c0_3 = arith.constant 0 : index
    %c0_4 = arith.constant 0 : index
    %5 = vector.load %arg16[%c0_3, %c0_4] : memref<32x32xf32, #tpu.memory_space<vmem>>, vector<8x32xf32>
    tpu.vector_store %arg16[%c0_3, %c0_4], %4 {strides = array<i32>} : memref<32x32xf32, #tpu.memory_space<vmem>>, vector<8x32xf32>,
    %cst_5 = arith.constant 0.000000e+00 : f32
    %6 = vector.broadcast %cst_5 : f32 to vector<8x32xf32>
    %c24 = arith.constant 24 : index
    %c0_6 = arith.constant 0 : index
    %7 = vector.load %arg16[%c24, %c0_6] : memref<32x32xf32, #tpu.memory_space<vmem>>, vector<8x32xf32>
    tpu.vector_store %arg16[%c24, %c0_6], %6 {strides = array<i32>} : memref<32x32xf32, #tpu.memory_space<vmem>>, vector<8x32xf32>,
    %8 = arith.mulf %0, %3 : vector<16x32xf32>
    %c8 = arith.constant 8 : index
    %c0_7 = arith.constant 0 : index
    %9 = vector.load %arg16[%c8, %c0_7] : memref<32x32xf32, #tpu.memory_space<vmem>>, vector<16x32xf32>
    tpu.vector_store %arg16[%c8, %c0_7], %8 {strides = array<i32>} : memref<32x32xf32, #tpu.memory_space<vmem>>, vector<16x32xf32>,
    %cst_8 = arith.constant 0.000000e+00 : f32
    %10 = vector.broadcast %cst_8 : f32 to vector<16x64xf32>
    %c7 = arith.constant 7 : index
    %c0_9 = arith.constant 0 : index
    %11 = vector.load %arg16[%c7, %c0_9] : memref<32x32xf32, #tpu.memory_space<vmem>>, vector<16x32xf32>
    %12 = arith.truncf %11 : vector<16x32xf32> to vector<16x32xbf16>
    %c0_10 = arith.constant 0 : index
    %c0_11 = arith.constant 0 : index
    %13 = vector.load %arg3[%c0_10, %c0_11] : memref<64x64xbf16, #tpu.memory_space<vmem>>, vector<32x64xbf16>
    %cst_12 = arith.constant dense<0.000000e+00> : vector<16x64xf32>
    %14 = tpu.matmul %12, %13, %cst_12 {dimension_numbers = #tpu.dot_dimension_numbers<[1], [0], [0], [1], [0, 0, 1, 1], [], []>} : vector<16x32xbf16>, vector<32x64xbf16>, vector<16x64xf32> -> vector<16x64xf32>
    %15 = arith.addf %10, %14 : vector<16x64xf32>
    %c8_13 = arith.constant 8 : index
    %c0_14 = arith.constant 0 : index
    %16 = vector.load %arg16[%c8_13, %c0_14] : memref<32x32xf32, #tpu.memory_space<vmem>>, vector<16x32xf32>
    %17 = arith.truncf %16 : vector<16x32xf32> to vector<16x32xbf16>
    %c32 = arith.constant 32 : index
    %c0_15 = arith.constant 0 : index
    %18 = vector.load %arg3[%c32, %c0_15] : memref<64x64xbf16, #tpu.memory_space<vmem>>, vector<32x64xbf16>
    %cst_16 = arith.constant dense<0.000000e+00> : vector<16x64xf32>
    %19 = tpu.matmul %17, %18, %cst_16 {dimension_numbers = #tpu.dot_dimension_numbers<[1], [0], [0], [1], [0, 0, 1, 1], [], []>} : vector<16x32xbf16>, vector<32x64xbf16>, vector<16x64xf32> -> vector<16x64xf32>
    %20 = arith.addf %15, %19 : vector<16x64xf32>
    %c0_17 = arith.constant 0 : index
    %c0_18 = arith.constant 0 : index
    %21 = vector.load %arg4[%c0_17, %c0_18] : memref<1x64xf32, #tpu.memory_space<vmem>>, vector<1x64xf32>
    %22 = vector.broadcast %21 : vector<1x64xf32> to vector<16x64xf32>
    %23 = arith.addf %20, %22 : vector<16x64xf32>
    %24 = vector.extract_strided_slice %23 {offsets = [0, 0], sizes = [16, 32], strides = [1, 1]} : vector<16x64xf32> to vector<16x32xf32>
    %25 = vector.extract_strided_slice %23 {offsets = [0, 32], sizes = [16, 32], strides = [1, 1]} : vector<16x64xf32> to vector<16x32xf32>
    %26 = arith.negf %25 : vector<16x32xf32>
    %27 = math.exp %26 : vector<16x32xf32>
    %cst_19 = arith.constant 1.000000e+00 : f32
    %28 = vector.broadcast %cst_19 : f32 to vector<16x32xf32>
    %29 = arith.addf %28, %27 : vector<16x32xf32>
    %30 = arith.divf %28, %29 : vector<16x32xf32>
    %31 = arith.mulf %24, %30 : vector<16x32xf32>
    %32 = arith.addf %31, %8 : vector<16x32xf32>
    %cst_20 = arith.constant 0.707106769 : f32
    %33 = vector.broadcast %cst_20 : f32 to vector<16x32xf32>
    %34 = arith.mulf %32, %33 : vector<16x32xf32>
    %35 = arith.mulf %34, %3 : vector<16x32xf32>
    %c8_21 = arith.constant 8 : index
    %c0_22 = arith.constant 0 : index
    %36 = vector.load %arg16[%c8_21, %c0_22] : memref<32x32xf32, #tpu.memory_space<vmem>>, vector<16x32xf32>
    tpu.vector_store %arg16[%c8_21, %c0_22], %35 {strides = array<i32>} : memref<32x32xf32, #tpu.memory_space<vmem>>, vector<16x32xf32>,
    %cst_23 = arith.constant 0.000000e+00 : f32
    %37 = vector.broadcast %cst_23 : f32 to vector<16x64xf32>
    %c6 = arith.constant 6 : index
    %c0_24 = arith.constant 0 : index
    %38 = vector.load %arg16[%c6, %c0_24] : memref<32x32xf32, #tpu.memory_space<vmem>>, vector<16x32xf32>
    %39 = arith.truncf %38 : vector<16x32xf32> to vector<16x32xbf16>
    %c0_25 = arith.constant 0 : index
    %c0_26 = arith.constant 0 : index
    %40 = vector.load %arg5[%c0_25, %c0_26] : memref<64x64xbf16, #tpu.memory_space<vmem>>, vector<32x64xbf16>
    %cst_27 = arith.constant dense<0.000000e+00> : vector<16x64xf32>
    %41 = tpu.matmul %39, %40, %cst_27 {dimension_numbers = #tpu.dot_dimension_numbers<[1], [0], [0], [1], [0, 0, 1, 1], [], []>} : vector<16x32xbf16>, vector<32x64xbf16>, vector<16x64xf32> -> vector<16x64xf32>
    %42 = arith.addf %37, %41 : vector<16x64xf32>
    %c8_28 = arith.constant 8 : index
    %c0_29 = arith.constant 0 : index
    %43 = vector.load %arg16[%c8_28, %c0_29] : memref<32x32xf32, #tpu.memory_space<vmem>>, vector<16x32xf32>
    %44 = arith.truncf %43 : vector<16x32xf32> to vector<16x32xbf16>
    %c32_30 = arith.constant 32 : index
    %c0_31 = arith.constant 0 : index
    %45 = vector.load %arg5[%c32_30, %c0_31] : memref<64x64xbf16, #tpu.memory_space<vmem>>, vector<32x64xbf16>
    %cst_32 = arith.constant dense<0.000000e+00> : vector<16x64xf32>
    %46 = tpu.matmul %44, %45, %cst_32 {dimension_numbers = #tpu.dot_dimension_numbers<[1], [0], [0], [1], [0, 0, 1, 1], [], []>} : vector<16x32xbf16>, vector<32x64xbf16>, vector<16x64xf32> -> vector<16x64xf32>
    %47 = arith.addf %42, %46 : vector<16x64xf32>
    %c0_33 = arith.constant 0 : index
    %c0_34 = arith.constant 0 : index
    %48 = vector.load %arg6[%c0_33, %c0_34] : memref<1x64xf32, #tpu.memory_space<vmem>>, vector<1x64xf32>
    %49 = vector.broadcast %48 : vector<1x64xf32> to vector<16x64xf32>
    %50 = arith.addf %47, %49 : vector<16x64xf32>
    %51 = vector.extract_strided_slice %50 {offsets = [0, 0], sizes = [16, 32], strides = [1, 1]} : vector<16x64xf32> to vector<16x32xf32>
    %52 = vector.extract_strided_slice %50 {offsets = [0, 32], sizes = [16, 32], strides = [1, 1]} : vector<16x64xf32> to vector<16x32xf32>
    %53 = arith.negf %52 : vector<16x32xf32>
    %54 = math.exp %53 : vector<16x32xf32>
    %cst_35 = arith.constant 1.000000e+00 : f32
    %55 = vector.broadcast %cst_35 : f32 to vector<16x32xf32>
    %56 = arith.addf %55, %54 : vector<16x32xf32>
    %57 = arith.divf %55, %56 : vector<16x32xf32>
    %58 = arith.mulf %51, %57 : vector<16x32xf32>
    %c8_36 = arith.constant 8 : index
    %c0_37 = arith.constant 0 : index
    %59 = vector.load %arg16[%c8_36, %c0_37] : memref<32x32xf32, #tpu.memory_space<vmem>>, vector<16x32xf32>
    tpu.vector_store %arg16[%c8_36, %c0_37], %58 {strides = array<i32>} : memref<32x32xf32, #tpu.memory_space<vmem>>, vector<16x32xf32>,
    %cst_38 = arith.constant 0.000000e+00 : f32
    %60 = vector.broadcast %cst_38 : f32 to vector<16x64xf32>
    %c6_39 = arith.constant 6 : index
    %c0_40 = arith.constant 0 : index
    %61 = vector.load %arg16[%c6_39, %c0_40] : memref<32x32xf32, #tpu.memory_space<vmem>>, vector<16x32xf32>
    %62 = arith.truncf %61 : vector<16x32xf32> to vector<16x32xbf16>
    %c0_41 = arith.constant 0 : index
    %c0_42 = arith.constant 0 : index
    %63 = vector.load %arg7[%c0_41, %c0_42] : memref<96x64xbf16, #tpu.memory_space<vmem>>, vector<32x64xbf16>
    %cst_43 = arith.constant dense<0.000000e+00> : vector<16x64xf32>
    %64 = tpu.matmul %62, %63, %cst_43 {dimension_numbers = #tpu.dot_dimension_numbers<[1], [0], [0], [1], [0, 0, 1, 1], [], []>} : vector<16x32xbf16>, vector<32x64xbf16>, vector<16x64xf32> -> vector<16x64xf32>
    %65 = arith.addf %60, %64 : vector<16x64xf32>
    %c7_44 = arith.constant 7 : index
    %c0_45 = arith.constant 0 : index
    %66 = vector.load %arg16[%c7_44, %c0_45] : memref<32x32xf32, #tpu.memory_space<vmem>>, vector<16x32xf32>
    %67 = arith.truncf %66 : vector<16x32xf32> to vector<16x32xbf16>
    %c32_46 = arith.constant 32 : index
    %c0_47 = arith.constant 0 : index
    %68 = vector.load %arg7[%c32_46, %c0_47] : memref<96x64xbf16, #tpu.memory_space<vmem>>, vector<32x64xbf16>
    %cst_48 = arith.constant dense<0.000000e+00> : vector<16x64xf32>
    %69 = tpu.matmul %67, %68, %cst_48 {dimension_numbers = #tpu.dot_dimension_numbers<[1], [0], [0], [1], [0, 0, 1, 1], [], []>} : vector<16x32xbf16>, vector<32x64xbf16>, vector<16x64xf32> -> vector<16x64xf32>
    %70 = arith.addf %65, %69 : vector<16x64xf32>
    %c8_49 = arith.constant 8 : index
    %c0_50 = arith.constant 0 : index
    %71 = vector.load %arg16[%c8_49, %c0_50] : memref<32x32xf32, #tpu.memory_space<vmem>>, vector<16x32xf32>
    %72 = arith.truncf %71 : vector<16x32xf32> to vector<16x32xbf16>
    %c64 = arith.constant 64 : index
    %c0_51 = arith.constant 0 : index
    %73 = vector.load %arg7[%c64, %c0_51] : memref<96x64xbf16, #tpu.memory_space<vmem>>, vector<32x64xbf16>
    %cst_52 = arith.constant dense<0.000000e+00> : vector<16x64xf32>
    %74 = tpu.matmul %72, %73, %cst_52 {dimension_numbers = #tpu.dot_dimension_numbers<[1], [0], [0], [1], [0, 0, 1, 1], [], []>} : vector<16x32xbf16>, vector<32x64xbf16>, vector<16x64xf32> -> vector<16x64xf32>
    %75 = arith.addf %70, %74 : vector<16x64xf32>
    %c0_53 = arith.constant 0 : index
    %c0_54 = arith.constant 0 : index
    %76 = vector.load %arg8[%c0_53, %c0_54] : memref<1x64xf32, #tpu.memory_space<vmem>>, vector<1x64xf32>
    %77 = vector.broadcast %76 : vector<1x64xf32> to vector<16x64xf32>
    %78 = arith.addf %75, %77 : vector<16x64xf32>
    %79 = vector.extract_strided_slice %78 {offsets = [0, 0], sizes = [16, 32], strides = [1, 1]} : vector<16x64xf32> to vector<16x32xf32>
    %80 = vector.extract_strided_slice %78 {offsets = [0, 32], sizes = [16, 32], strides = [1, 1]} : vector<16x64xf32> to vector<16x32xf32>
    %81 = arith.negf %80 : vector<16x32xf32>
    %82 = math.exp %81 : vector<16x32xf32>
    %cst_55 = arith.constant 1.000000e+00 : f32
    %83 = vector.broadcast %cst_55 : f32 to vector<16x32xf32>
    %84 = arith.addf %83, %82 : vector<16x32xf32>
    %85 = arith.divf %83, %84 : vector<16x32xf32>
    %86 = arith.mulf %79, %85 : vector<16x32xf32>
    %87 = arith.addf %86, %35 : vector<16x32xf32>
    %cst_56 = arith.constant 0.707106769 : f32
    %88 = vector.broadcast %cst_56 : f32 to vector<16x32xf32>
    %89 = arith.mulf %87, %88 : vector<16x32xf32>
    %90 = arith.mulf %0, %3 : vector<16x32xf32>
    %c8_57 = arith.constant 8 : index
    %c0_58 = arith.constant 0 : index
    %91 = vector.load %arg16[%c8_57, %c0_58] : memref<32x32xf32, #tpu.memory_space<vmem>>, vector<16x32xf32>
    tpu.vector_store %arg16[%c8_57, %c0_58], %90 {strides = array<i32>} : memref<32x32xf32, #tpu.memory_space<vmem>>, vector<16x32xf32>,
    %cst_59 = arith.constant 0.000000e+00 : f32
    %92 = vector.broadcast %cst_59 : f32 to vector<16x64xf32>
    %c8_60 = arith.constant 8 : index
    %c0_61 = arith.constant 0 : index
    %93 = vector.load %arg16[%c8_60, %c0_61] : memref<32x32xf32, #tpu.memory_space<vmem>>, vector<16x32xf32>
    %94 = arith.truncf %93 : vector<16x32xf32> to vector<16x32xbf16>
    %c0_62 = arith.constant 0 : index
    %c0_63 = arith.constant 0 : index
    %95 = vector.load %arg9[%c0_62, %c0_63] : memref<64x64xbf16, #tpu.memory_space<vmem>>, vector<32x64xbf16>
    %cst_64 = arith.constant dense<0.000000e+00> : vector<16x64xf32>
    %96 = tpu.matmul %94, %95, %cst_64 {dimension_numbers = #tpu.dot_dimension_numbers<[1], [0], [0], [1], [0, 0, 1, 1], [], []>} : vector<16x32xbf16>, vector<32x64xbf16>, vector<16x64xf32> -> vector<16x64xf32>
    %97 = arith.addf %92, %96 : vector<16x64xf32>
    %c9 = arith.constant 9 : index
    %c0_65 = arith.constant 0 : index
    %98 = vector.load %arg16[%c9, %c0_65] : memref<32x32xf32, #tpu.memory_space<vmem>>, vector<16x32xf32>
    %99 = arith.truncf %98 : vector<16x32xf32> to vector<16x32xbf16>
    %c32_66 = arith.constant 32 : index
    %c0_67 = arith.constant 0 : index
    %100 = vector.load %arg9[%c32_66, %c0_67] : memref<64x64xbf16, #tpu.memory_space<vmem>>, vector<32x64xbf16>
    %cst_68 = arith.constant dense<0.000000e+00> : vector<16x64xf32>
    %101 = tpu.matmul %99, %100, %cst_68 {dimension_numbers = #tpu.dot_dimension_numbers<[1], [0], [0], [1], [0, 0, 1, 1], [], []>} : vector<16x32xbf16>, vector<32x64xbf16>, vector<16x64xf32> -> vector<16x64xf32>
    %102 = arith.addf %97, %101 : vector<16x64xf32>
    %c0_69 = arith.constant 0 : index
    %c0_70 = arith.constant 0 : index
    %103 = vector.load %arg10[%c0_69, %c0_70] : memref<1x64xf32, #tpu.memory_space<vmem>>, vector<1x64xf32>
    %104 = vector.broadcast %103 : vector<1x64xf32> to vector<16x64xf32>
    %105 = arith.addf %102, %104 : vector<16x64xf32>
    %106 = vector.extract_strided_slice %105 {offsets = [0, 0], sizes = [16, 32], strides = [1, 1]} : vector<16x64xf32> to vector<16x32xf32>
    %107 = vector.extract_strided_slice %105 {offsets = [0, 32], sizes = [16, 32], strides = [1, 1]} : vector<16x64xf32> to vector<16x32xf32>
    %108 = arith.negf %107 : vector<16x32xf32>
    %109 = math.exp %108 : vector<16x32xf32>
    %cst_71 = arith.constant 1.000000e+00 : f32
    %110 = vector.broadcast %cst_71 : f32 to vector<16x32xf32>
    %111 = arith.addf %110, %109 : vector<16x32xf32>
    %112 = arith.divf %110, %111 : vector<16x32xf32>
    %113 = arith.mulf %106, %112 : vector<16x32xf32>
    %114 = arith.addf %113, %90 : vector<16x32xf32>
    %cst_72 = arith.constant 0.707106769 : f32
    %115 = vector.broadcast %cst_72 : f32 to vector<16x32xf32>
    %116 = arith.mulf %114, %115 : vector<16x32xf32>
    %117 = arith.mulf %116, %3 : vector<16x32xf32>
    %c8_73 = arith.constant 8 : index
    %c0_74 = arith.constant 0 : index
    %118 = vector.load %arg16[%c8_73, %c0_74] : memref<32x32xf32, #tpu.memory_space<vmem>>, vector<16x32xf32>
    tpu.vector_store %arg16[%c8_73, %c0_74], %117 {strides = array<i32>} : memref<32x32xf32, #tpu.memory_space<vmem>>, vector<16x32xf32>,
    %cst_75 = arith.constant 0.000000e+00 : f32
    %119 = vector.broadcast %cst_75 : f32 to vector<16x64xf32>
    %c8_76 = arith.constant 8 : index
    %c0_77 = arith.constant 0 : index
    %120 = vector.load %arg16[%c8_76, %c0_77] : memref<32x32xf32, #tpu.memory_space<vmem>>, vector<16x32xf32>
    %121 = arith.truncf %120 : vector<16x32xf32> to vector<16x32xbf16>
    %c0_78 = arith.constant 0 : index
    %c0_79 = arith.constant 0 : index
    %122 = vector.load %arg11[%c0_78, %c0_79] : memref<64x64xbf16, #tpu.memory_space<vmem>>, vector<32x64xbf16>
    %cst_80 = arith.constant dense<0.000000e+00> : vector<16x64xf32>
    %123 = tpu.matmul %121, %122, %cst_80 {dimension_numbers = #tpu.dot_dimension_numbers<[1], [0], [0], [1], [0, 0, 1, 1], [], []>} : vector<16x32xbf16>, vector<32x64xbf16>, vector<16x64xf32> -> vector<16x64xf32>
    %124 = arith.addf %119, %123 : vector<16x64xf32>
    %c10 = arith.constant 10 : index
    %c0_81 = arith.constant 0 : index
    %125 = vector.load %arg16[%c10, %c0_81] : memref<32x32xf32, #tpu.memory_space<vmem>>, vector<16x32xf32>
    %126 = arith.truncf %125 : vector<16x32xf32> to vector<16x32xbf16>
    %c32_82 = arith.constant 32 : index
    %c0_83 = arith.constant 0 : index
    %127 = vector.load %arg11[%c32_82, %c0_83] : memref<64x64xbf16, #tpu.memory_space<vmem>>, vector<32x64xbf16>
    %cst_84 = arith.constant dense<0.000000e+00> : vector<16x64xf32>
    %128 = tpu.matmul %126, %127, %cst_84 {dimension_numbers = #tpu.dot_dimension_numbers<[1], [0], [0], [1], [0, 0, 1, 1], [], []>} : vector<16x32xbf16>, vector<32x64xbf16>, vector<16x64xf32> -> vector<16x64xf32>
    %129 = arith.addf %124, %128 : vector<16x64xf32>
    %c0_85 = arith.constant 0 : index
    %c0_86 = arith.constant 0 : index
    %130 = vector.load %arg12[%c0_85, %c0_86] : memref<1x64xf32, #tpu.memory_space<vmem>>, vector<1x64xf32>
    %131 = vector.broadcast %130 : vector<1x64xf32> to vector<16x64xf32>
    %132 = arith.addf %129, %131 : vector<16x64xf32>
    %133 = vector.extract_strided_slice %132 {offsets = [0, 0], sizes = [16, 32], strides = [1, 1]} : vector<16x64xf32> to vector<16x32xf32>
    %134 = vector.extract_strided_slice %132 {offsets = [0, 32], sizes = [16, 32], strides = [1, 1]} : vector<16x64xf32> to vector<16x32xf32>
    %135 = arith.negf %134 : vector<16x32xf32>
    %136 = math.exp %135 : vector<16x32xf32>
    %cst_87 = arith.constant 1.000000e+00 : f32
    %137 = vector.broadcast %cst_87 : f32 to vector<16x32xf32>
    %138 = arith.addf %137, %136 : vector<16x32xf32>
    %139 = arith.divf %137, %138 : vector<16x32xf32>
    %140 = arith.mulf %133, %139 : vector<16x32xf32>
    %c8_88 = arith.constant 8 : index
    %c0_89 = arith.constant 0 : index
    %141 = vector.load %arg16[%c8_88, %c0_89] : memref<32x32xf32, #tpu.memory_space<vmem>>, vector<16x32xf32>
    tpu.vector_store %arg16[%c8_88, %c0_89], %140 {strides = array<i32>} : memref<32x32xf32, #tpu.memory_space<vmem>>, vector<16x32xf32>,
    %cst_90 = arith.constant 0.000000e+00 : f32
    %142 = vector.broadcast %cst_90 : f32 to vector<16x64xf32>
    %c8_91 = arith.constant 8 : index
    %c0_92 = arith.constant 0 : index
    %143 = vector.load %arg16[%c8_91, %c0_92] : memref<32x32xf32, #tpu.memory_space<vmem>>, vector<16x32xf32>
    %144 = arith.truncf %143 : vector<16x32xf32> to vector<16x32xbf16>
    %c0_93 = arith.constant 0 : index
    %c0_94 = arith.constant 0 : index
    %145 = vector.load %arg13[%c0_93, %c0_94] : memref<96x64xbf16, #tpu.memory_space<vmem>>, vector<32x64xbf16>
    %cst_95 = arith.constant dense<0.000000e+00> : vector<16x64xf32>
    %146 = tpu.matmul %144, %145, %cst_95 {dimension_numbers = #tpu.dot_dimension_numbers<[1], [0], [0], [1], [0, 0, 1, 1], [], []>} : vector<16x32xbf16>, vector<32x64xbf16>, vector<16x64xf32> -> vector<16x64xf32>
    %147 = arith.addf %142, %146 : vector<16x64xf32>
    %c9_96 = arith.constant 9 : index
    %c0_97 = arith.constant 0 : index
    %148 = vector.load %arg16[%c9_96, %c0_97] : memref<32x32xf32, #tpu.memory_space<vmem>>, vector<16x32xf32>
    %149 = arith.truncf %148 : vector<16x32xf32> to vector<16x32xbf16>
    %c32_98 = arith.constant 32 : index
    %c0_99 = arith.constant 0 : index
    %150 = vector.load %arg13[%c32_98, %c0_99] : memref<96x64xbf16, #tpu.memory_space<vmem>>, vector<32x64xbf16>
    %cst_100 = arith.constant dense<0.000000e+00> : vector<16x64xf32>
    %151 = tpu.matmul %149, %150, %cst_100 {dimension_numbers = #tpu.dot_dimension_numbers<[1], [0], [0], [1], [0, 0, 1, 1], [], []>} : vector<16x32xbf16>, vector<32x64xbf16>, vector<16x64xf32> -> vector<16x64xf32>
    %152 = arith.addf %147, %151 : vector<16x64xf32>
    %c10_101 = arith.constant 10 : index
    %c0_102 = arith.constant 0 : index
    %153 = vector.load %arg16[%c10_101, %c0_102] : memref<32x32xf32, #tpu.memory_space<vmem>>, vector<16x32xf32>
    %154 = arith.truncf %153 : vector<16x32xf32> to vector<16x32xbf16>
    %c64_103 = arith.constant 64 : index
    %c0_104 = arith.constant 0 : index
    %155 = vector.load %arg13[%c64_103, %c0_104] : memref<96x64xbf16, #tpu.memory_space<vmem>>, vector<32x64xbf16>
    %cst_105 = arith.constant dense<0.000000e+00> : vector<16x64xf32>
    %156 = tpu.matmul %154, %155, %cst_105 {dimension_numbers = #tpu.dot_dimension_numbers<[1], [0], [0], [1], [0, 0, 1, 1], [], []>} : vector<16x32xbf16>, vector<32x64xbf16>, vector<16x64xf32> -> vector<16x64xf32>
    %157 = arith.addf %152, %156 : vector<16x64xf32>
    %c0_106 = arith.constant 0 : index
    %c0_107 = arith.constant 0 : index
    %158 = vector.load %arg14[%c0_106, %c0_107] : memref<1x64xf32, #tpu.memory_space<vmem>>, vector<1x64xf32>
    %159 = vector.broadcast %158 : vector<1x64xf32> to vector<16x64xf32>
    %160 = arith.addf %157, %159 : vector<16x64xf32>
    %161 = vector.extract_strided_slice %160 {offsets = [0, 0], sizes = [16, 32], strides = [1, 1]} : vector<16x64xf32> to vector<16x32xf32>
    %162 = vector.extract_strided_slice %160 {offsets = [0, 32], sizes = [16, 32], strides = [1, 1]} : vector<16x64xf32> to vector<16x32xf32>
    %163 = arith.negf %162 : vector<16x32xf32>
    %164 = math.exp %163 : vector<16x32xf32>
    %cst_108 = arith.constant 1.000000e+00 : f32
    %165 = vector.broadcast %cst_108 : f32 to vector<16x32xf32>
    %166 = arith.addf %165, %164 : vector<16x32xf32>
    %167 = arith.divf %165, %166 : vector<16x32xf32>
    %168 = arith.mulf %161, %167 : vector<16x32xf32>
    %169 = arith.addf %168, %117 : vector<16x32xf32>
    %cst_109 = arith.constant 0.707106769 : f32
    %170 = vector.broadcast %cst_109 : f32 to vector<16x32xf32>
    %171 = arith.mulf %169, %170 : vector<16x32xf32>
    %172 = tpu.concatenate %34, %116, %89, %171 in 1 : vector<16x32xf32>, vector<16x32xf32>, vector<16x32xf32>, vector<16x32xf32> -> vector<16x128xf32>
    %c0_110 = arith.constant 0 : index
    %c0_111 = arith.constant 0 : index
    %173 = vector.load %arg15[%c0_110, %c0_111] : memref<16x128xf32, #tpu.memory_space<vmem>>, vector<16x128xf32>
    tpu.vector_store %arg15[%c0_110, %c0_111], %172 {strides = array<i32>} : memref<16x128xf32, #tpu.memory_space<vmem>>, vector<16x128xf32>,
    return
  }
  func.func @transform_0(%arg0: i32) -> (i32, i32) {
    %c0_i32 = arith.constant 0 : i32
    %c0_i32_0 = arith.constant 0 : i32
    return %arg0, %c0_i32 : i32, i32
  }
  func.func @transform_1(%arg0: i32) -> (i32, i32) {
    %c0_i32 = arith.constant 0 : i32
    %c0_i32_0 = arith.constant 0 : i32
    return %arg0, %c0_i32 : i32, i32
  }
  func.func @transform_2(%arg0: i32) -> (i32, i32) {
    %c0_i32 = arith.constant 0 : i32
    %c0_i32_0 = arith.constant 0 : i32
    %c0_i32_1 = arith.constant 0 : i32
    return %c0_i32, %c0_i32_0 : i32, i32
  }
  func.func @transform_3(%arg0: i32) -> (i32, i32) {
    %c0_i32 = arith.constant 0 : i32
    %c0_i32_0 = arith.constant 0 : i32
    %c0_i32_1 = arith.constant 0 : i32
    return %c0_i32, %c0_i32_0 : i32, i32
  }
  func.func @transform_4(%arg0: i32) -> (i32, i32) {
    %c0_i32 = arith.constant 0 : i32
    %c0_i32_0 = arith.constant 0 : i32
    %c0_i32_1 = arith.constant 0 : i32
    return %c0_i32, %c0_i32_0 : i32, i32
  }
  func.func @transform_5(%arg0: i32) -> (i32, i32) {
    %c0_i32 = arith.constant 0 : i32
    %c0_i32_0 = arith.constant 0 : i32
    %c0_i32_1 = arith.constant 0 : i32
    return %c0_i32, %c0_i32_0 : i32, i32
  }
  func.func @transform_6(%arg0: i32) -> (i32, i32) {
    %c0_i32 = arith.constant 0 : i32
    %c0_i32_0 = arith.constant 0 : i32
    %c0_i32_1 = arith.constant 0 : i32
    return %c0_i32, %c0_i32_0 : i32, i32
  }
  func.func @transform_7(%arg0: i32) -> (i32, i32) {
    %c0_i32 = arith.constant 0 : i32
    %c0_i32_0 = arith.constant 0 : i32
    %c0_i32_1 = arith.constant 0 : i32
    return %c0_i32, %c0_i32_0 : i32, i32
  }
  func.func @transform_8(%arg0: i32) -> (i32, i32) {
    %c0_i32 = arith.constant 0 : i32
    %c0_i32_0 = arith.constant 0 : i32
    %c0_i32_1 = arith.constant 0 : i32
    return %c0_i32, %c0_i32_0 : i32, i32
  }
  func.func @transform_9(%arg0: i32) -> (i32, i32) {
    %c0_i32 = arith.constant 0 : i32
    %c0_i32_0 = arith.constant 0 : i32
    %c0_i32_1 = arith.constant 0 : i32
    return %c0_i32, %c0_i32_0 : i32, i32
  }
  func.func @transform_10(%arg0: i32) -> (i32, i32) {
    %c0_i32 = arith.constant 0 : i32
    %c0_i32_0 = arith.constant 0 : i32
    %c0_i32_1 = arith.constant 0 : i32
    return %c0_i32, %c0_i32_0 : i32, i32
  }
  func.func @transform_11(%arg0: i32) -> (i32, i32) {
    %c0_i32 = arith.constant 0 : i32
    %c0_i32_0 = arith.constant 0 : i32
    %c0_i32_1 = arith.constant 0 : i32
    return %c0_i32, %c0_i32_0 : i32, i32
  }
  func.func @transform_12(%arg0: i32) -> (i32, i32) {
    %c0_i32 = arith.constant 0 : i32
    %c0_i32_0 = arith.constant 0 : i32
    %c0_i32_1 = arith.constant 0 : i32
    return %c0_i32, %c0_i32_0 : i32, i32
  }
  func.func @transform_13(%arg0: i32) -> (i32, i32) {
    %c0_i32 = arith.constant 0 : i32
    %c0_i32_0 = arith.constant 0 : i32
    %c0_i32_1 = arith.constant 0 : i32
    return %c0_i32, %c0_i32_0 : i32, i32
  }
  func.func @transform_14(%arg0: i32) -> (i32, i32) {
    %c0_i32 = arith.constant 0 : i32
    %c0_i32_0 = arith.constant 0 : i32
    return %arg0, %c0_i32 : i32, i32
  }
}

</mosaic_0001>

<bundles_post_ra>
// kernel: tpu_custom_call.1
= control target key start
LH: loop header
LB: loop body
LE: loop exit
PB: predicated region body
PF: predicated region fallthrough
CT: control target
= control target key end

     0   :  { %19 = vsyncpa [#allocation4], 0  ;;  %s2718_s0 = inlined_call_operand.vmem [shape: f32[32,32], index: 0, kind: input, shape index: {}]   ;;  %s2719_s1 = inlined_call_operand.vmem [shape: f32[32,1], index: 1, kind: input, shape index: {}]   ;;  %s2720_s2 = inlined_call_operand.vmem [shape: bf16[64,64], index: 2, kind: input, shape index: {}]   ;;  %s2721_s3 = inlined_call_operand.vmem [shape: f32[1,64], index: 3, kind: input, shape index: {}]   ;;  %s2722_s4 = inlined_call_operand.vmem [shape: bf16[64,64], index: 4, kind: input, shape index: {}]   ;;  %s2723_s5 = inlined_call_operand.vmem [shape: f32[1,64], index: 5, kind: input, shape index: {}]   ;;  %s2724_s6 = inlined_call_operand.vmem [shape: bf16[96,64], index: 6, kind: input, shape index: {}]   ;;  %s2725_s7 = inlined_call_operand.vmem [shape: f32[1,64], index: 7, kind: input, shape index: {}]   ;;  %s2726_s8 = inlined_call_operand.vmem [shape: bf16[64,64], index: 8, kind: input, shape index: {}]   ;;  %s2727_s9 = inlined_call_operand.hbm [shape: f32[1,64], index: 9, kind: input, shape index: {}]   ;;  %s2728_s10 = inlined_call_operand.vmem [shape: bf16[64,64], index: 10, kind: input, shape index: {}]   ;;  %s2729_s11 = inlined_call_operand.vmem [shape: f32[1,64], index: 11, kind: input, shape index: {}]   ;;  %s2730_s12 = inlined_call_operand.vmem [shape: bf16[96,64], index: 12, kind: input, shape index: {}]   ;;  %s2731_s13 = inlined_call_operand.vmem [shape: f32[1,64], index: 13, kind: input, shape index: {}]   ;;  %s2732_s14 = inlined_call_operand.hbm [shape: f32[32,128], index: 14, kind: output, shape index: {}]  }
   0x1   :  { %20 = vsyncpa [#allocation5], 0 }
   0x2   :  { %22 = vsyncpa [#allocation5 + $0x1], 0  ;;  %s2309_s29 = smov 0   ;;  %s2311_s30 = smov 0  }
   0x3   :  { %s2313_s15 = smov 0   ;;  %s2315_s16 = smov 0  }
   0x4 LB: > { %2740 = sst [smem:[#allocation9_spill]] %s2218_s15  ;;  %s2330_s17 = sadd.s32 4294967295, %s2222_s16   ;;  %s2222_s16 = sphi %s2315_s16, %s2754_s16   ;;  %s2218_s15 = sphi %s2313_s15, %s2759_s15   ;;  %s2214_s30 = sphi %s2311_s30, %s2758_s30   ;;  %s2210_s29 = sphi %s2309_s29, %s2757_s29  }
   0x5   : > { %s1762_s18 = sadd.s32 4294967294, %s2222_s16   ;;  %s2334_s19 = sadd.s32 1, %s2222_s16  }
   0x6   : > { %2741 = sst [smem:[#allocation10_spill]] %s2334_s19  ;;  %s339_s20 = sadd.s32 1, %s2218_s15 }
   0x7   : > { %s336_s21 = ssub.s32 %s2222_s16, %s2334_s19  ;;  %p349_p0 = scmp.ne.s32.totalorder %s2218_s15, %s2214_s30 }
   0x8   : > { %p337_p1 = scmp.eq.s32.totalorder %s336_s21, 0  ;;  %p350_p2 = scmp.eq.s32.totalorder %s2330_s17, 1 }
   0x9   : > { %p355_p3 = scmp.ne.s32.totalorder %s2214_s30, %s2210_s29  ;;  %p356_p4 = scmp.eq.s32.totalorder %s1762_s18, 1 }
   0xa   : > { %s2345_s22 = scalar_select %p337_p1, %s2218_s15, %s339_s20  }
   0xb   : > { %p2347_p5 = por %p350_p2, %p349_p0  ;;  %p2351_p6 = por %p356_p4, %p355_p3 }
   0xc   : > { %2742 = sst [smem:[#allocation11_spill]] %s2345_s22  ;;  %p1763_p7 = scmp.ge.s32.totalorder %s2222_s16, 1 }
   0xd   : > { %s2743_s23 = scalar_select %p2347_p5, 1, 0 }
   0xe   : > { %s2744_s24 = scalar_select %p2351_p6, 1, 0 }
   0xf   : > { %p363_p8 = scmp.lt.s32.totalorder %s2222_s16, 3  ;;  %p2737_p9 = scmp.eq.s32.totalorder %s2330_s17, 0 }
  0x10   : > { %2745 = sst [smem:[#allocation12_spill]] %s2744_s24  ;;  %s2224_s26 = smov [#allocation3]  }
  0x11   : > { %p2358_p10 = pnand %p1763_p7, %p363_p8  ;;  %s397_s27 = sshll.u32 %s2224_s26, 4  ;;  %s398_s27 = int_to_ptr.vmem [resolvable:$true] %s397_s27 }
  0x12   : > { %s2128_s21 = scalar_lea.hbm %s2727_s9, 16 }
  0x13   : > { %s2746_s25 = scalar_select %p2358_p10, 1, 0 }
  0x14   : > { %p1999_p11 = pneg %p2358_p10  ;;  %p2129_p13 = scmp.ne.s32.totalorder %s2727_s9, %s2128_s21 }
  0x15   : > { %p2135_p3 = scmp.lt.u32.totalorder %s2128_s21, %s2727_s9 }
  0x16   : > { %p2366_p12 = pnand %p2737_p9, %p1999_p11 }
  0x18   : > { %p2130_p0 = pneg %p2366_p12 }
  0x1a   : > { %p2131_p1 = pnand %p2130_p0, %p2129_p13 }
  0x1c   : > { %p2132_p2 = pneg %p2131_p1 }
  0x1e   : > { %p2137_p4 = pnand %p2135_p3, %p2132_p2 }
  0x20   : > { %2140 = shalt.err (!%p2137_p4)
}
  0x21   : > { %s2141_s24 = scalar_lea.vmem %s398_s27, 16  ;;  %s2148_s18 = scalar_lea.vmem %s398_s27, 32 }
  0x22   : > { %p2142_p7 = scmp.ne.s32.totalorder %s398_s27, %s2141_s24  ;;  %p2149_p9 = scmp.lt.s32.totalorder %s398_s27, %s398_s27 }
  0x23   : > { %p2150_p6 = scmp.lt.s32.totalorder %s2148_s18, %s2141_s24 }
  0x24   : > { %p2144_p8 = pnand %p2142_p7, %p2130_p0 }
  0x25   : > { %p2151_p5 = por %p2150_p6, %p2149_p9 }
  0x26   : > { %p2145_p11 = pneg %p2144_p8 }
  0x28   : > { %p2152_p10 = pnand %p2151_p5, %p2145_p11 }
  0x2a   : > { %2155 = shalt.err (!%p2152_p10)
}
  0x2b   : > { %2002 = dma.hbm_to_vmem [thread:$0]  (!%p2366_p12), %s2727_s9, 16, %s398_s27, [#allocation4]  }
  0x2c   : > { %p2748_p13 = scmp.ne.s32.totalorder %s2746_s25, 0 }
  0x2d   : > { %p2749_p1 = scmp.eq.s32.totalorder (!%p2748_p13), %s2330_s17, 0 }
  0x2e   : > { %440 = sbr.rel (%p2748_p13) target bundleno = 2227 (0x8b3), region = 76 }
  0x35   : > { %2201 = dma.done.wait (%p2749_p1), [#allocation4], 16   ;;  %p2750_p0 = pmov %p2749_p1 }
  0x36   : > { %s1769_s19 = sshll.u32 %s2330_s17, 1  ;;  %v2225_v0 = vmov 0   ;;  %vm519_vm0 = vcmask 261120   ;;  %v2226_v3 = vmov 0.0   ;;  %v2052_v4 = vld [vmem:[%s2720_s2 + $0x10] sm:$0xff]   ;;  %v2053_v5 = vld [vmem:[%s2720_s2] sm:$0xff]  }
  0x37   : > { %2203 = vsyncadd (%p2750_p0), [#allocation4], 4294967280  ;;  %2051 = vset.pattern.permute.xlu0 %v2225_v0  ;;  %p492_p5 = scmp.lt.s32.totalorder %s1769_s19, 3  ;;  %1881 = vmatprep.subr.bf16.mxu0 %v2226_v3  ;;  %520 = vst.msk [vmem:[#allocation2] sm:$0xff] %vm519_vm0, %v2226_v3  ;;  %v2054_v6 = vld [vmem:[%s2720_s2 + $0x18] sm:$0xff]   ;;  %v2055_v7 = vld [vmem:[%s2720_s2 + $0x8] sm:$0xff]  }
  0x38   : > { %521 = vst.msk [vmem:[#allocation2 + $0x18] sm:$0xff] %vm519_vm0, %v2226_v3  ;;  %1889 = vmatprep.subr.bf16.mxu1 %v2226_v3  ;;  %vm2227_vm1 = vmmov 0   ;;  %1882 = vmatpush3.bf16.msra.mxu0 %v2052_v4  ;;  %v1779_v22 = vld [vmem:[%s2721_s3] ss:$0 sm:$0xff]  ;;  %v2056_v40 = vld [vmem:[%s2722_s4 + $0x10] sm:$0xff]   ;;  %v2058_v42 = vld [vmem:[%s2722_s4 + $0x18] sm:$0xff]  }
  0x39   : > { %s2761_s19 = smov (!%p492_p5, %s1769_s19), 3  ;;  %1885 = vmatprep.mubr.msk.bf16.mxu0 %vm2227_vm1, %v2226_v3  ;;  %1893 = vmatprep.mubr.msk.bf16.mxu1 %vm2227_vm1, %v2226_v3  ;;  %v2057_v41 = vld [vmem:[%s2722_s4] sm:$0xff]   ;;  %v2059_v43 = vld [vmem:[%s2722_s4 + $0x8] sm:$0xff]   ;;  %vm1654_vm2 = vcmask 523264   ;;  %vm1657_vm3 = vcmask 785408   ;;  %s1838_s15 = sshll.u32 %s2330_s17, 8 }
  0x3a   : > { %s1770_s24 = sshll.u32 %s2761_s19, 3  ;;  %1890 = vmatpush3.bf16.msra.mxu1 %v2053_v5  ;;  %1883 = vmatprep.subr.bf16.mxu0 %v2226_v3  ;;  %s2228_s19 = smov 96   ;;  %v1788_v63 = vld [vmem:[%s2723_s5] ss:$0 sm:$0xff] }
  0x3b   : > { %s501_s25 = scalar_lea.vmem %s2719_s1, %s1770_s24  ;;  %1891 = vmatprep.subr.bf16.mxu1 %v2226_v3  ;;  %s495_s20 = scalar_lea.vmem %s2718_s0, %s1770_s24 }
  0x3c   : > { %v507_v1 = vld [vmem:[%s501_s25] sm:$0xff]  ;;  %v508_v2 = vld [vmem:[%s501_s25 + $0x8] sm:$0xff]  ;;  %1884 = vmatpush3.bf16.msra.mxu0 %v2054_v6  ;;  %s2229_s25 = smov 32   ;;  %s488_s24 = sand.u32 1, %s2214_s30  }
  0x3d   : > { %511 = vperm.xlu0 %2051, %v507_v1   ;;  %1897 = vmatprep.subr.bf16.mxu0 %v2226_v3  ;;  %v505_v8 = vld [vmem:[%s495_s20] sm:$0xff]  ;;  %v506_v11 = vld [vmem:[%s495_s20 + $0x8] sm:$0xff]  ;;  %s2230_s20 = smov 64   ;;  %s1768_s21 = sshll.u32 %s488_s24, 4 }
  0x3e   : > { %1892 = vmatpush3.bf16.msra.mxu1 %v2055_v7  ;;  %s490_s26 = scalar_lea.vmem [#allocation6], %s1768_s21  ;;  %s2675_s28 = scalar_lea.hbm %s2732_s14, %s1838_s15 }
  0x3f   : > { %1905 = vmatprep.subr.bf16.mxu1 %v2226_v3  ;;  %s1676_s18 = sshll.u32 %s490_s26, 4  ;;  %s2677_s17 = scalar_lea.sflag [#allocation5], %s488_s24  ;;  %s2670_s18 = int_to_ptr.vmem [resolvable:$true] %s1676_s18 }
  0x40   : > { %s2156_s27 = scalar_lea.vmem %s2670_s18, 256  ;;  %p2751_p9 = scmp.ne.s32.totalorder %s2743_s23, 0 }
  0x41   : > { %516 = vperm.xlu0 %2051, %v508_v2   ;;  %p2157_p6 = scmp.ne.s32.totalorder %s2670_s18, %s2156_s27 }
  0x43   : > { %p2158_p10 = pnand %p2157_p6, %p2751_p9 }
  0x45   : > { %p2159_p12 = pneg %p2158_p10 }
  0xbc   : > { %v2428_v9 = vpop.permute.xlu0 %511 }
  0xbd   : > { %v2431_v10 = vmul.f32 %v2428_v9, %v505_v8 }
  0xbf   : > { %524 = vst.msk [vmem:[#allocation2 + $0x8] sm:$0xff] %vm519_vm0, %v2431_v10 }
  0xc0   : > { %v2435_v12 = vpop.permute.xlu0 %516 }
  0xc1   : > { %v2438_v13 = vmul.f32 %v2435_v12, %v506_v11 }
  0xc3   : > { %525 = vst.msk [vmem:[#allocation2 + $0x10] sm:$0xff] %vm519_vm0, %v2438_v13 }
  0xc6   : > { %v533_v14 = vld [vmem:[#allocation2 + $0x8] sm:$0xff] }
  0xc7   : > { %v526_v16 = vld [vmem:[#allocation2 + $0x7] sm:$0xff] }
  0xca   : > { %v534_v15 = vld [vmem:[#allocation2 + $0x10] sm:$0xff] }
  0xcb   : > { %v527_v17 = vld [vmem:[#allocation2 + $0xf] sm:$0xff]  ;;  %v535_v18 = vpack.c.bf16 %v534_v15, %v533_v14 }
  0xcc   : > { %v528_v19 = vpack.c.bf16 %v527_v17, %v526_v16 }
  0xcd   : > { %1886 = vmatmul.mubr.msk.bf16.vlgmr.msra.gmra.mrb[0].mxu0 %vm519_vm0, %v535_v18 }
  0xce   : > { %1894 = vmatmul.mubr.msk.bf16.vlgmr.msra.gmra.mrb[0].mxu1 %vm519_vm0, %v528_v19  ;;  %1901 = vmatprep.mubr.msk.bf16.mxu0 %vm2227_vm1, %v2226_v3 }
  0xcf   : > { %1909 = vmatprep.mubr.msk.bf16.mxu1 %vm2227_vm1, %v2226_v3  ;;  %1898 = vmatpush3.bf16.msra.mxu0 %v2056_v40 }
  0xd0   : > { %1906 = vmatpush3.bf16.msra.mxu1 %v2057_v41  ;;  %1899 = vmatprep.subr.bf16.mxu0 %v2226_v3  ;;  %v2066_v41 = vld [vmem:[%s2724_s6 + $0x28] sm:$0xff]  }
  0xd1   : > { %1907 = vmatprep.subr.bf16.mxu1 %v2226_v3 }
  0xd3   : > { %1900 = vmatpush3.bf16.msra.mxu0 %v2058_v42  ;;  %v2067_v42 = vld [vmem:[%s2726_s8 + $0x18] sm:$0xff]  }
  0xd4   : > { %1908 = vmatpush3.bf16.msra.mxu1 %v2059_v43  ;;  %1913 = vmatprep.subr.bf16.mxu0 %v2226_v3 }
  0xd5   : > { %1921 = vmatprep.subr.bf16.mxu1 %v2226_v3 }
 0x1a0   : > { %v589_v20 = vpop.f32.mrb[0].mxu0 }
 0x1a1   : > { %v645_v21 = vpop.f32.mrb[0].mxu1  ;;  %v1887_v24 = vpop.f32.mrb[1].mxu0 }
 0x1a2   : > { %v646_v23 = vadd.f32 %v645_v21, %v589_v20  ;;  %v1895_v25 = vpop.f32.mrb[1].mxu1  ;;  %v592_v26 = vpop.f32.mrb[2].mxu0  ;;  %v2060_v21 = vld [vmem:[%s2724_s6 + $0x10] sm:$0xff]   ;;  %v2063_v24 = vld [vmem:[%s2724_s6 + $0x8] sm:$0xff]  }
 0x1a3   : > { %v648_v27 = vpop.f32.mrb[2].mxu1  ;;  %v1888_v30 = vpop.f32.mrb[3].mxu0 }
 0x1a4   : > { %v659_v28 = vadd.f32 %v1779_v22, %v646_v23  ;;  %v649_v29 = vadd.f32 %v648_v27, %v592_v26  ;;  %v1896_v31 = vpop.f32.mrb[3].mxu1  ;;  %v2062_v23 = vld [vmem:[%s2724_s6 + $0x18] sm:$0xff]  }
 0x1a5   : > { %v2064_v31 = vld [vmem:[%s2724_s6 + $0x20] sm:$0xff]  }
 0x1a6   : > { %v1780_v32 = vmul.f32 -1.442695, %v659_v28  ;;  %v660_v33 = vadd.f32 %v1779_v22, %v649_v29  ;;  %v2061_v22 = vld [vmem:[%s2724_s6] sm:$0xff]  }
 0x1a8   : > { %2080 = vpow2.f32 %v1780_v32  ;;  %v1781_v34 = vmul.f32 -1.442695, %v660_v33  ;;  %v2065_v32 = vld [vmem:[%s2726_s8 + $0x10] sm:$0xff]  }
 0x1aa   : > { %2082 = vpow2.f32 %v1781_v34 }
 0x1b2   : > { %v2081_v35 = vpop.eup %2080 }
 0x1b3   : > { %v667_v36 = vadd.f32 1.0, %v2081_v35 }
 0x1b4   : > { %v2083_v37 = vpop.eup %2082 }
 0x1b5   : > { %2084 = vrcp.f32 %v667_v36  ;;  %v668_v38 = vadd.f32 1.0, %v2083_v37 }
 0x1b7   : > { %2086 = vrcp.f32 %v668_v38 }
 0x1bf   : > { %v2085_v39 = vpop.eup %2084 }
 0x1c0   : > { %675 = vrot.lane.b32.xlu1 %v2085_v39, %s2228_s19 }
 0x1c1   : > { %v2087_v44 = vpop.eup %2086 }
 0x1c4   : > { %677 = vrot.lane.b32.xlu1 %v2087_v44, %s2228_s19 }
 0x232   : > { %v676_v45 = vpop.permute.xlu1 %675 }
 0x233   : > { %v681_v46 = vmul.f32 %v676_v45, %v659_v28  ;;  %v2068_v45 = vld [vmem:[%s2726_s8] sm:$0xff]  }
 0x235   : > { %v683_v47 = vadd.f32 %v681_v46, %v2431_v10 }
 0x236   : > { %v678_v48 = vpop.permute.xlu1 %677 }
 0x237   : > { %v2470_v49 = vmul.f32 0.70710677, %v683_v47  ;;  %v682_v50 = vmul.f32 %v678_v48, %v660_v33  ;;  %v2069_v48 = vld [vmem:[%s2726_s8 + $0x8] sm:$0xff]  }
 0x239   : > { %v2474_v51 = vmul.f32 %v2470_v49, %v2428_v9  ;;  %v684_v52 = vadd.f32 %v682_v50, %v2438_v13 }
 0x23b   : > { %689 = vst.msk [vmem:[#allocation2 + $0x8] sm:$0xff] %vm519_vm0, %v2474_v51  ;;  %v2479_v53 = vmul.f32 0.70710677, %v684_v52 }
 0x23d   : > { %v2483_v54 = vmul.f32 %v2479_v53, %v2435_v12 }
 0x23f   : > { %690 = vst.msk [vmem:[#allocation2 + $0x10] sm:$0xff] %vm519_vm0, %v2483_v54 }
 0x242   : > { %v698_v55 = vld [vmem:[#allocation2 + $0x8] sm:$0xff] }
 0x243   : > { %v691_v57 = vld [vmem:[#allocation2 + $0x6] sm:$0xff] }
 0x246   : > { %v699_v56 = vld [vmem:[#allocation2 + $0x10] sm:$0xff] }
 0x247   : > { %v692_v58 = vld [vmem:[#allocation2 + $0xe] sm:$0xff]  ;;  %v700_v59 = vpack.c.bf16 %v699_v56, %v698_v55 }
 0x248   : > { %v693_v60 = vpack.c.bf16 %v692_v58, %v691_v57 }
 0x249   : > { %1902 = vmatmul.mubr.msk.bf16.vlgmr.msra.gmra.mrb[4].mxu0 %vm519_vm0, %v700_v59 }
 0x24a   : > { %1910 = vmatmul.mubr.msk.bf16.vlgmr.msra.gmra.mrb[4].mxu1 %vm519_vm0, %v693_v60  ;;  %1917 = vmatprep.mubr.msk.bf16.mxu0 %vm2227_vm1, %v2226_v3 }
 0x24b   : > { %1925 = vmatprep.mubr.msk.bf16.mxu1 %vm2227_vm1, %v2226_v3  ;;  %1914 = vmatpush3.bf16.msra.mxu0 %v2060_v21 }
 0x24c   : > { %1922 = vmatpush3.bf16.msra.mxu1 %v2061_v22  ;;  %1915 = vmatprep.subr.bf16.mxu0 %v2226_v3 }
 0x24d   : > { %1923 = vmatprep.subr.bf16.mxu1 %v2226_v3 }
 0x24f   : > { %1916 = vmatpush3.bf16.msra.mxu0 %v2062_v23 }
 0x250   : > { %1924 = vmatpush3.bf16.msra.mxu1 %v2063_v24  ;;  %1929 = vmatprep.subr.bf16.mxu0 %v2226_v3 }
 0x251   : > { %1937 = vmatprep.subr.bf16.mxu1 %v2226_v3 }
 0x31c   : > { %v754_v61 = vpop.f32.mrb[4].mxu0 }
 0x31d   : > { %v810_v62 = vpop.f32.mrb[4].mxu1  ;;  %v1903_v1 = vpop.f32.mrb[5].mxu0 }
 0x31e   : > { %v811_v0 = vadd.f32 %v810_v62, %v754_v61  ;;  %v1911_v2 = vpop.f32.mrb[5].mxu1  ;;  %v757_v4 = vpop.f32.mrb[6].mxu0 }
 0x31f   : > { %v813_v5 = vpop.f32.mrb[6].mxu1  ;;  %v1904_v8 = vpop.f32.mrb[7].mxu0 }
 0x320   : > { %v824_v6 = vadd.f32 %v1788_v63, %v811_v0  ;;  %v814_v7 = vadd.f32 %v813_v5, %v757_v4  ;;  %v1912_v11 = vpop.f32.mrb[7].mxu1 }
 0x322   : > { %v1789_v14 = vmul.f32 -1.442695, %v824_v6  ;;  %v825_v15 = vadd.f32 %v1788_v63, %v814_v7 }
 0x324   : > { %2088 = vpow2.f32 %v1789_v14  ;;  %v1790_v16 = vmul.f32 -1.442695, %v825_v15 }
 0x326   : > { %2090 = vpow2.f32 %v1790_v16 }
 0x32e   : > { %v2089_v17 = vpop.eup %2088 }
 0x32f   : > { %v832_v18 = vadd.f32 1.0, %v2089_v17 }
 0x330   : > { %v2091_v19 = vpop.eup %2090 }
 0x331   : > { %2092 = vrcp.f32 %v832_v18  ;;  %v833_v20 = vadd.f32 1.0, %v2091_v19  ;;  %v1809_v18 = vld [vmem:[#allocation3] ss:$0 sm:$0xff] }
 0x333   : > { %2094 = vrcp.f32 %v833_v20 }
 0x33b   : > { %v2093_v25 = vpop.eup %2092 }
 0x33c   : > { %840 = vrot.lane.b32.xlu0 %v2093_v25, %s2228_s19 }
 0x33d   : > { %v2095_v26 = vpop.eup %2094 }
 0x33e   : > { %842 = vrot.lane.b32.xlu1 %v2095_v26, %s2228_s19 }
 0x3ae   : > { %v841_v27 = vpop.permute.xlu0 %840 }
 0x3af   : > { %v846_v28 = vmul.f32 %v841_v27, %v824_v6 }
 0x3b0   : > { %v843_v29 = vpop.permute.xlu1 %842 }
 0x3b1   : > { %848 = vst.msk [vmem:[#allocation2 + $0x8] sm:$0xff] %vm519_vm0, %v846_v28  ;;  %v847_v30 = vmul.f32 %v843_v29, %v825_v15 }
 0x3b3   : > { %849 = vst.msk [vmem:[#allocation2 + $0x10] sm:$0xff] %vm519_vm0, %v847_v30 }
 0x3b8   : > { %v857_v33 = vld [vmem:[#allocation2 + $0x7] sm:$0xff] }
 0x3b9   : > { %v850_v34 = vld [vmem:[#allocation2 + $0x6] sm:$0xff] }
 0x3ba   : > { %v976_v35 = vld [vmem:[#allocation2 + $0x8] sm:$0xff]  ;;  %v977_v38 = vld [vmem:[#allocation2 + $0x10] sm:$0xff] }
 0x3bb   : > { %v858_v36 = vld [vmem:[#allocation2 + $0xf] sm:$0xff]  ;;  %v978_v46 = vpack.c.bf16 %v977_v38, %v976_v35  ;;  %v2072_v35 = vld [vmem:[%s2728_s10 + $0x18] sm:$0xff]  }
 0x3bc   : > { %v851_v37 = vld [vmem:[#allocation2 + $0xe] sm:$0xff]  ;;  %v859_v39 = vpack.c.bf16 %v858_v36, %v857_v33  ;;  %v2071_v33 = vld [vmem:[%s2728_s10] sm:$0xff]  }
 0x3bd   : > { %v852_v40 = vpack.c.bf16 %v851_v37, %v850_v34  ;;  %1077 = vst.msk [vmem:[#allocation2 + $0x10] sm:$0xff] %vm519_vm0, %v2438_v13  ;;  %1076 = vst.msk [vmem:[#allocation2 + $0x8] sm:$0xff] %vm519_vm0, %v2431_v10  ;;  %v2073_v36 = vld [vmem:[%s2728_s10 + $0x8] sm:$0xff]  }
 0x3be   : > { %1918 = vmatmul.mubr.msk.bf16.vlgmr.msra.gmra.mrb[8].mxu0 %vm519_vm0, %v859_v39 }
 0x3bf   : > { %1926 = vmatmul.mubr.msk.bf16.vlgmr.msra.gmra.mrb[8].mxu1 %vm519_vm0, %v852_v40  ;;  %1930 = vmatpush3.bf16.msra.mxu0 %v2064_v31 }
 0x3c0   : > { %1938 = vmatpush3.bf16.msra.mxu1 %v2065_v32  ;;  %1931 = vmatprep.subr.bf16.mxu0 %v2226_v3  ;;  %v2070_v32 = vld [vmem:[%s2728_s10 + $0x10] sm:$0xff]  }
 0x3c1   : > { %1939 = vmatprep.subr.bf16.mxu1 %v2226_v3  ;;  %1933 = vmatprep.mubr.msk.bf16.mxu0 %vm2227_vm1, %v2226_v3 }
 0x3c2   : > { %1941 = vmatprep.mubr.msk.bf16.mxu1 %vm2227_vm1, %v2226_v3 }
 0x3c3   : > { %1932 = vmatpush3.bf16.msra.mxu0 %v2066_v41 }
 0x3c4   : > { %1940 = vmatpush3.bf16.msra.mxu1 %v2067_v42  ;;  %v1085_v43 = vld [vmem:[#allocation2 + $0x9] sm:$0xff]  ;;  %v1086_v44 = vld [vmem:[#allocation2 + $0x11] sm:$0xff]  ;;  %1945 = vmatprep.subr.bf16.mxu0 %v2226_v3 }
 0x3c5   : > { %v1087_v47 = vpack.c.bf16 %v1086_v44, %v1085_v43  ;;  %1953 = vmatprep.subr.bf16.mxu1 %v2226_v3  ;;  %v1078_v50 = vld [vmem:[#allocation2 + $0x8] sm:$0xff]  ;;  %v1079_v52 = vld [vmem:[#allocation2 + $0x10] sm:$0xff] }
 0x3c6   : > { %1934 = vmatmul.mubr.msk.bf16.vlgmr.msra.gmra.mrb[12].mxu0 %vm519_vm0, %v978_v46  ;;  %v1080_v55 = vpack.c.bf16 %v1079_v52, %v1078_v50 }
 0x3c7   : > { %1942 = vmatmul.mubr.msk.bf16.vlgmr.msra.gmra.mrb[12].mxu1 %vm519_vm0, %v1087_v47  ;;  %1946 = vmatpush3.bf16.msra.mxu0 %v2068_v45 }
 0x3c8   : > { %1949 = vmatprep.mubr.msk.bf16.mxu0 %vm2227_vm1, %v2226_v3  ;;  %1947 = vmatprep.subr.bf16.mxu0 %v2226_v3 }
 0x3c9   : > { %1957 = vmatprep.mubr.msk.bf16.mxu1 %vm2227_vm1, %v2226_v3  ;;  %1954 = vmatpush3.bf16.msra.mxu1 %v2070_v32 }
 0x3ca   : > { %1955 = vmatprep.subr.bf16.mxu1 %v2226_v3 }
 0x3cb   : > { %1948 = vmatpush3.bf16.msra.mxu0 %v2069_v48 }
 0x3cc   : > { %1961 = vmatprep.subr.bf16.mxu0 %v2226_v3 }
 0x3cd   : > { %1956 = vmatpush3.bf16.msra.mxu1 %v2072_v35 }
 0x3ce   : > { %1950 = vmatmul.mubr.msk.bf16.vlgmr.msra.gmra.mrb[16].mxu0 %vm519_vm0, %v1080_v55  ;;  %1969 = vmatprep.subr.bf16.mxu1 %v2226_v3 }
 0x3cf   : > { %1965 = vmatprep.mubr.msk.bf16.mxu0 %vm2227_vm1, %v2226_v3  ;;  %1962 = vmatpush3.bf16.msra.mxu0 %v2071_v33 }
 0x3d0   : > { %1963 = vmatprep.subr.bf16.mxu0 %v2226_v3 }
 0x3d3   : > { %1964 = vmatpush3.bf16.msra.mxu0 %v2073_v36  ;;  %v2078_v36 = vld [vmem:[%s2730_s12 + $0x20] sm:$0xff]  }
 0x3d4   : > { %1977 = vmatprep.subr.bf16.mxu0 %v2226_v3 }
 0x491   : > { %v913_v56 = vpop.f32.mrb[8].mxu0 }
 0x492   : > { %v969_v57 = vpop.f32.mrb[8].mxu1  ;;  %v1919_v59 = vpop.f32.mrb[9].mxu0 }
 0x493   : > { %v970_v58 = vadd.f32 %v969_v57, %v913_v56  ;;  %v1927_v60 = vpop.f32.mrb[9].mxu1  ;;  %v916_v61 = vpop.f32.mrb[10].mxu0  ;;  %v1818_v59 = vld [vmem:[%s2729_s11] ss:$0 sm:$0xff] }
 0x494   : > { %v972_v62 = vpop.f32.mrb[10].mxu1  ;;  %v1920_v0 = vpop.f32.mrb[11].mxu0 }
 0x495   : > { %v973_v63 = vadd.f32 %v972_v62, %v916_v61  ;;  %v1928_v1 = vpop.f32.mrb[11].mxu1 }
 0x499   : > { %v1032_v2 = vpop.f32.mrb[12].mxu0 }
 0x49a   : > { %v1141_v4 = vpop.f32.mrb[12].mxu1  ;;  %v2559_v5 = vadd.f32 %v1032_v2, %v970_v58  ;;  %v1935_v6 = vpop.f32.mrb[13].mxu0 }
 0x49b   : > { %v1943_v7 = vpop.f32.mrb[13].mxu1  ;;  %v1035_v8 = vpop.f32.mrb[14].mxu0 }
 0x49c   : > { %v1144_v11 = vpop.f32.mrb[14].mxu1  ;;  %v1040_v14 = vadd.f32 %v1035_v8, %v973_v63  ;;  %v1936_v15 = vpop.f32.mrb[15].mxu0 }
 0x49d   : > { %v1944_v16 = vpop.f32.mrb[15].mxu1 }
 0x4a1   : > { %v1197_v17 = vpop.f32.mrb[16].mxu0 }
 0x4a2   : > { %v1198_v19 = vadd.f32 %v1197_v17, %v1141_v4  ;;  %v1951_v20 = vpop.f32.mrb[17].mxu0 }
 0x4a3   : > { %v1200_v21 = vpop.f32.mrb[18].mxu0 }
 0x4a4   : > { %v1211_v22 = vadd.f32 %v1809_v18, %v1198_v19  ;;  %v1201_v23 = vadd.f32 %v1200_v21, %v1144_v11  ;;  %v1952_v24 = vpop.f32.mrb[19].mxu0 }
 0x4a5   : > { %v2075_v24 = vld [vmem:[%s2730_s12] sm:$0xff]  }
 0x4a6   : > { %v1810_v25 = vmul.f32 -1.442695, %v1211_v22  ;;  %v1212_v26 = vadd.f32 %v1809_v18, %v1201_v23  ;;  %v2074_v23 = vld [vmem:[%s2730_s12 + $0x10] sm:$0xff]  }
 0x4a8   : > { %2096 = vpow2.f32 %v1810_v25  ;;  %v1811_v27 = vmul.f32 -1.442695, %v1212_v26  ;;  %v2076_v25 = vld [vmem:[%s2730_s12 + $0x18] sm:$0xff]  }
 0x4aa   : > { %2098 = vpow2.f32 %v1811_v27 }
 0x4b2   : > { %v2097_v28 = vpop.eup %2096 }
 0x4b3   : > { %v1219_v29 = vadd.f32 1.0, %v2097_v28 }
 0x4b4   : > { %v2099_v30 = vpop.eup %2098 }
 0x4b5   : > { %2100 = vrcp.f32 %v1219_v29  ;;  %v1220_v31 = vadd.f32 1.0, %v2099_v30 }
 0x4b7   : > { %2102 = vrcp.f32 %v1220_v31 }
 0x4bf   : > { %v2101_v34 = vpop.eup %2100 }
 0x4c0   : > { %1227 = vrot.lane.b32.xlu0 %v2101_v34, %s2228_s19 }
 0x4c1   : > { %v2103_v37 = vpop.eup %2102 }
 0x4c2   : > { %1229 = vrot.lane.b32.xlu1 %v2103_v37, %s2228_s19 }
 0x532   : > { %v1228_v38 = vpop.permute.xlu0 %1227 }
 0x533   : > { %v1233_v39 = vmul.f32 %v1228_v38, %v1211_v22 }
 0x534   : > { %v1230_v40 = vpop.permute.xlu1 %1229 }
 0x535   : > { %v1235_v41 = vadd.f32 %v1233_v39, %v2431_v10  ;;  %v1234_v42 = vmul.f32 %v1230_v40, %v1212_v26  ;;  %v2077_v26 = vld [vmem:[%s2730_s12 + $0x8] sm:$0xff]  }
 0x537   : > { %v2580_v43 = vmul.f32 0.70710677, %v1235_v41  ;;  %v1236_v44 = vadd.f32 %v1234_v42, %v2438_v13  ;;  %v2079_v42 = vld [vmem:[%s2730_s12 + $0x28] sm:$0xff]  }
 0x539   : > { %v2585_v45 = vmul.f32 %v2580_v43, %v2428_v9  ;;  %v2587_v46 = vmul.f32 0.70710677, %v1236_v44  ;;  %v1800_v9 = vld [vmem:[%s2725_s7] ss:$0 sm:$0xff] }
 0x53a   : > { %v2609_v56 = vadd.f32 %v1800_v9, %v1040_v14 }
 0x53b   : > { %1241 = vst.msk [vmem:[#allocation2 + $0x8] sm:$0xff] %vm519_vm0, %v2585_v45  ;;  %v2593_v47 = vmul.f32 %v2587_v46, %v2435_v12  ;;  %v2607_v12 = vadd.f32 %v1800_v9, %v2559_v5 }
 0x53c   : > { %v1802_v7 = vmul.f32 -1.442695, %v2609_v56 }
 0x53d   : > { %1242 = vst.msk [vmem:[#allocation2 + $0x10] sm:$0xff] %vm519_vm0, %v2593_v47  ;;  %v1801_v63 = vmul.f32 -1.442695, %v2607_v12 }
 0x53f   : > { %2104 = vpow2.f32 %v1801_v63 }
 0x542   : > { %v1243_v10 = vld [vmem:[#allocation2 + $0x8] sm:$0xff] }
 0x544   : > { %v1250_v48 = vld [vmem:[#allocation2 + $0xa] sm:$0xff]  ;;  %v1251_v50 = vld [vmem:[#allocation2 + $0x12] sm:$0xff] }
 0x545   : > { %v1244_v13 = vld [vmem:[#allocation2 + $0x10] sm:$0xff]  ;;  %v1252_v52 = vpack.c.bf16 %v1251_v50, %v1250_v48 }
 0x546   : > { %v1245_v55 = vpack.c.bf16 %v1244_v13, %v1243_v10 }
 0x547   : > { %1958 = vmatmul.mubr.msk.bf16.vlgmr.msra.gmra.mrb[16].mxu1 %vm519_vm0, %v1252_v52 }
 0x548   : > { %1966 = vmatmul.mubr.msk.bf16.vlgmr.msra.gmra.mrb[20].mxu0 %vm519_vm0, %v1245_v55  ;;  %1973 = vmatprep.mubr.msk.bf16.mxu1 %vm2227_vm1, %v2226_v3 }
 0x549   : > { %1981 = vmatprep.mubr.msk.bf16.mxu0 %vm2227_vm1, %v2226_v3  ;;  %v2105_v15 = vpop.eup %2104  ;;  %1970 = vmatpush3.bf16.msra.mxu1 %v2074_v23 }
 0x54a   : > { %v1056_v20 = vadd.f32 1.0, %v2105_v15  ;;  %1978 = vmatpush3.bf16.msra.mxu0 %v2075_v24  ;;  %1971 = vmatprep.subr.bf16.mxu1 %v2226_v3 }
 0x54b   : > { %1979 = vmatprep.subr.bf16.mxu0 %v2226_v3 }
 0x54d   : > { %1972 = vmatpush3.bf16.msra.mxu1 %v2076_v25 }
 0x54e   : > { %1980 = vmatpush3.bf16.msra.mxu0 %v2077_v26  ;;  %1985 = vmatprep.subr.bf16.mxu1 %v2226_v3 }
 0x61a   : > { %v1306_v57 = vpop.f32.mrb[16].mxu1 }
 0x61b   : > { %v1362_v58 = vpop.f32.mrb[20].mxu0  ;;  %v1959_v61 = vpop.f32.mrb[17].mxu1 }
 0x61c   : > { %v1363_v60 = vadd.f32 %v1362_v58, %v1306_v57  ;;  %v1967_v62 = vpop.f32.mrb[21].mxu0  ;;  %v1309_v0 = vpop.f32.mrb[18].mxu1 }
 0x61d   : > { %v1365_v1 = vpop.f32.mrb[22].mxu0  ;;  %v1960_v6 = vpop.f32.mrb[19].mxu1 }
 0x61e   : > { %v1376_v2 = vadd.f32 %v1818_v59, %v1363_v60  ;;  %v1366_v4 = vadd.f32 %v1365_v1, %v1309_v0  ;;  %v1968_v5 = vpop.f32.mrb[23].mxu0 }
 0x620   : > { %v1819_v8 = vmul.f32 -1.442695, %v1376_v2  ;;  %v1377_v11 = vadd.f32 %v1818_v59, %v1366_v4 }
 0x622   : > { %2106 = vpow2.f32 %v1819_v8  ;;  %v1820_v14 = vmul.f32 -1.442695, %v1377_v11 }
 0x623   : > { %2108 = vpow2.f32 %v1802_v7 }
 0x624   : > { %2110 = vpow2.f32 %v1820_v14 }
 0x62c   : > { %v2107_v16 = vpop.eup %2106 }
 0x62d   : > { %v2109_v17 = vpop.eup %2108  ;;  %v1384_v18 = vadd.f32 1.0, %v2107_v16 }
 0x62e   : > { %v2111_v19 = vpop.eup %2110  ;;  %v1057_v22 = vadd.f32 1.0, %v2109_v17 }
 0x62f   : > { %2112 = vrcp.f32 %v1384_v18  ;;  %v1385_v21 = vadd.f32 1.0, %v2111_v19 }
 0x631   : > { %2114 = vrcp.f32 %v1385_v21 }
 0x632   : > { %2116 = vrcp.f32 %v1056_v20 }
 0x633   : > { %2118 = vrcp.f32 %v1057_v22 }
 0x639   : > { %v2113_v27 = vpop.eup %2112 }
 0x63a   : > { %1392 = vrot.lane.b32.xlu0 %v2113_v27, %s2228_s19 }
 0x63b   : > { %v2115_v28 = vpop.eup %2114 }
 0x63c   : > { %1394 = vrot.lane.b32.xlu1 %v2115_v28, %s2228_s19  ;;  %v2117_v29 = vpop.eup %2116 }
 0x63d   : > { %v2119_v30 = vpop.eup %2118 }
 0x63e   : > { %1064 = vrot.lane.b32.xlu0 %v2117_v29, %s2228_s19 }
 0x640   : > { %1066 = vrot.lane.b32.xlu1 %v2119_v30, %s2228_s19 }
 0x6ac   : > { %v1393_v31 = vpop.permute.xlu0 %1392 }
 0x6ad   : > { %v1398_v32 = vmul.f32 %v1393_v31, %v1376_v2 }
 0x6ae   : > { %v1395_v33 = vpop.permute.xlu1 %1394 }
 0x6af   : > { %1400 = vst.msk [vmem:[#allocation2 + $0x8] sm:$0xff] %vm519_vm0, %v1398_v32  ;;  %v1399_v34 = vmul.f32 %v1395_v33, %v1377_v11 }
 0x6b0   : > { %v1065_v17 = vpop.permute.xlu0 %1064 }
 0x6b1   : > { %1401 = vst.msk [vmem:[#allocation2 + $0x10] sm:$0xff] %vm519_vm0, %v1399_v34  ;;  %v1070_v19 = vmul.f32 %v1065_v17, %v2607_v12 }
 0x6b2   : > { %v1067_v18 = vpop.permute.xlu1 %1066 }
 0x6b3   : > { %v1071_v21 = vmul.f32 %v1067_v18, %v2609_v56  ;;  %v1072_v23 = vadd.f32 %v1070_v19, %v2474_v51 }
 0x6b5   : > { %v1073_v24 = vadd.f32 %v1071_v21, %v2483_v54  ;;  %v1074_v25 = vmul.f32 0.70710677, %v1072_v23 }
 0x6b6   : > { %v1402_v35 = vld [vmem:[#allocation2 + $0x8] sm:$0xff] }
 0x6b7   : > { %v1075_v12 = vmul.f32 0.70710677, %v1073_v24 }
 0x6b8   : > { %v1409_v37 = vld [vmem:[#allocation2 + $0x9] sm:$0xff]  ;;  %v1410_v38 = vld [vmem:[#allocation2 + $0x11] sm:$0xff] }
 0x6b9   : > { %v1403_v39 = vld [vmem:[#allocation2 + $0x10] sm:$0xff]  ;;  %v1411_v40 = vpack.c.bf16 %v1410_v38, %v1409_v37 }
 0x6ba   : > { %v1404_v41 = vpack.c.bf16 %v1403_v39, %v1402_v35  ;;  %v1528_v44 = vld [vmem:[#allocation2 + $0xa] sm:$0xff]  ;;  %v1529_v10 = vld [vmem:[#allocation2 + $0x12] sm:$0xff] }
 0x6bb   : > { %1974 = vmatmul.mubr.msk.bf16.vlgmr.msra.gmra.mrb[20].mxu1 %vm519_vm0, %v1411_v40  ;;  %v1530_v48 = vpack.c.bf16 %v1529_v10, %v1528_v44 }
 0x6bc   : > { %1982 = vmatmul.mubr.msk.bf16.vlgmr.msra.gmra.mrb[24].mxu0 %vm519_vm0, %v1404_v41  ;;  %1986 = vmatpush3.bf16.msra.mxu1 %v2078_v36 }
 0x6bd   : > { %1989 = vmatprep.mubr.msk.bf16.mxu1 %vm2227_vm1, %v2226_v3  ;;  %1987 = vmatprep.subr.bf16.mxu1 %v2226_v3  ;;  %v1830_v3 = vld [vmem:[%s2731_s13] ss:$0 sm:$0xff] }
 0x6c0   : > { %1988 = vmatpush3.bf16.msra.mxu1 %v2079_v42 }
 0x6c3   : > { %1990 = vmatmul.mubr.msk.bf16.vlgmr.msra.gmra.mrb[24].mxu1 %vm519_vm0, %v1530_v48 }
 0x78e   : > { %v1465_v50 = vpop.f32.mrb[20].mxu1 }
 0x78f   : > { %v1521_v13 = vpop.f32.mrb[24].mxu0  ;;  %v1975_v55 = vpop.f32.mrb[21].mxu1 }
 0x790   : > { %v1522_v52 = vadd.f32 %v1521_v13, %v1465_v50  ;;  %v1983_v9 = vpop.f32.mrb[25].mxu0  ;;  %v1468_v57 = vpop.f32.mrb[22].mxu1 }
 0x791   : > { %v1524_v58 = vpop.f32.mrb[26].mxu0  ;;  %v1976_v60 = vpop.f32.mrb[23].mxu1 }
 0x792   : > { %v1525_v59 = vadd.f32 %v1524_v58, %v1468_v57  ;;  %v1984_v61 = vpop.f32.mrb[27].mxu0 }
 0x796   : > { %v1584_v62 = vpop.f32.mrb[24].mxu1 }
 0x797   : > { %v1591_v63 = vadd.f32 %v1584_v62, %v1522_v52  ;;  %v1991_v0 = vpop.f32.mrb[25].mxu1 }
 0x798   : > { %v1587_v1 = vpop.f32.mrb[26].mxu1 }
 0x799   : > { %v1600_v2 = vadd.f32 %v1830_v3, %v1591_v63  ;;  %v1592_v4 = vadd.f32 %v1587_v1, %v1525_v59  ;;  %v1992_v6 = vpop.f32.mrb[27].mxu1 }
 0x79b   : > { %v1831_v5 = vmul.f32 -1.442695, %v1600_v2  ;;  %v1601_v7 = vadd.f32 %v1830_v3, %v1592_v4 }
 0x79d   : > { %2120 = vpow2.f32 %v1831_v5  ;;  %v1832_v8 = vmul.f32 -1.442695, %v1601_v7 }
 0x79f   : > { %2122 = vpow2.f32 %v1832_v8 }
 0x7a7   : > { %v2121_v11 = vpop.eup %2120 }
 0x7a8   : > { %v1608_v14 = vadd.f32 1.0, %v2121_v11 }
 0x7a9   : > { %v2123_v15 = vpop.eup %2122 }
 0x7aa   : > { %2124 = vrcp.f32 %v1608_v14  ;;  %v1609_v16 = vadd.f32 1.0, %v2123_v15 }
 0x7ac   : > { %2126 = vrcp.f32 %v1609_v16 }
 0x7b4   : > { %v2125_v20 = vpop.eup %2124 }
 0x7b5   : > { %1616 = vrot.lane.b32.xlu0 %v2125_v20, %s2228_s19 }
 0x7b6   : > { %v2127_v22 = vpop.eup %2126 }
 0x7b7   : > { %1618 = vrot.lane.b32.xlu1 %v2127_v22, %s2228_s19 }
 0x7b9   : > { %1630 = vrot.lane.b32.xlu0 %v2580_v43, %s2229_s25 }
 0x7bb   : > { %1632 = vrot.lane.b32.xlu1 %v2587_v46, %s2229_s25  ;;  %s2231_s25 = smov [#allocation6]  }
 0x7bd   : > { %1638 = vrot.lane.b32.xlu0 %v1074_v25, %s2230_s20 }
 0x7bf   : > { %1640 = vrot.lane.b32.xlu1 %v1075_v12, %s2230_s20  ;;  %s2160_s20 = sshll.u32 %s2231_s25, 4  ;;  %s2161_s20 = int_to_ptr.vmem [resolvable:$false] %s2160_s20 }
 0x7c0   : > { %s2162_s21 = scalar_lea.vmem %s2161_s20, 512  ;;  %p2163_p2 = scmp.lt.s32.totalorder %s2670_s18, %s2161_s20 }
 0x7c1   : > { %p2164_p3 = scmp.lt.s32.totalorder %s2162_s21, %s2156_s27 }
 0x7c3   : > { %p2165_p4 = por %p2164_p3, %p2163_p2 }
 0x7c5   : > { %p2166_p7 = pnand %p2165_p4, %p2159_p12 }
 0x827   : > { %v1617_v56 = vpop.permute.xlu0 %1616 }
 0x828   : > { %v1622_v26 = vmul.f32 %v1617_v56, %v1600_v2 }
 0x829   : > { %v1619_v27 = vpop.permute.xlu1 %1618 }
 0x82a   : > { %v1624_v51 = vadd.f32 %v1622_v26, %v2585_v45  ;;  %v1623_v28 = vmul.f32 %v1619_v27, %v1601_v7 }
 0x82b   : > { %v1631_v43 = vpop.permute.xlu0 %1630 }
 0x82c   : > { %v1626_v29 = vmul.f32 0.70710677, %v1624_v51  ;;  %v1625_v54 = vadd.f32 %v1623_v28, %v2593_v47  ;;  %v1652_v45 = vsel %vm519_vm0, %v2470_v49, %v1631_v43 }
 0x82d   : > { %v1633_v46 = vpop.permute.xlu1 %1632 }
 0x82e   : > { %v1627_v30 = vmul.f32 0.70710677, %v1625_v54  ;;  %1646 = vrot.lane.b32.xlu0 %v1626_v29, %s2228_s19  ;;  %v1653_v34 = vsel %vm519_vm0, %v2479_v53, %v1633_v46 }
 0x82f   : > { %v1639_v31 = vpop.permute.xlu0 %1638 }
 0x830   : > { %1648 = vrot.lane.b32.xlu1 %v1627_v30, %s2228_s19  ;;  %v1655_v47 = vsel %vm1654_vm2, %v1652_v45, %v1639_v31 }
 0x831   : > { %v1641_v32 = vpop.permute.xlu1 %1640 }
 0x832   : > { %v1656_v36 = vsel %vm1654_vm2, %v1653_v34, %v1641_v32 }
 0x8a0   : > { %v1647_v33 = vpop.permute.xlu0 %1646 }
 0x8a1   : > { %v1658_v35 = vsel %vm1657_vm3, %v1655_v47, %v1647_v33 }
 0x8a2   : > { %1660 = vst [vmem:[%s490_s26] sm:$0xff] %v1658_v35  ;;  %v1649_v37 = vpop.permute.xlu1 %1648 }
 0x8a3   : > { %v1659_v49 = vsel %vm1657_vm3, %v1656_v36, %v1649_v37 }
 0x8a4   : > { %1661 = vst [vmem:[%s490_s26 + $0x8] sm:$0xff] %v1659_v49 }
 0x8a5   : > { %2169 = shalt.err (!%p2166_p7)
}
 0x8a6   : > { %s2170_s24 = scalar_lea.hbm %s2675_s28, 256  ;;  %s2174_s19 = scalar_lea.hbm %s2732_s14, 512 }
 0x8a7   : > { %p2171_p8 = scmp.ne.s32.totalorder %s2675_s28, %s2170_s24  ;;  %p2175_p1 = scmp.lt.u32.totalorder %s2675_s28, %s2732_s14 }
 0x8a8   : > { %p2176_p0 = scmp.lt.u32.totalorder %s2174_s19, %s2170_s24  ;;  %p2178_p6 = scmp.lt.u32.totalorder %s2170_s24, %s2675_s28 }
 0x8a9   : > { %p2172_p11 = pnand %p2171_p8, %p2751_p9 }
 0x8aa   : > { %p2177_p5 = por %p2176_p0, %p2175_p1 }
 0x8ab   : > { %p2173_p13 = pneg %p2172_p11 }
 0x8ac   : > { %p2179_p10 = por %p2178_p6, %p2177_p5 }
 0x8ae   : > { %p2180_p12 = pnand %p2179_p10, %p2173_p13 }
 0x8b0   : > { %2183 = shalt.err (!%p2180_p12)
}
 0x8b1   : > { %s2232_s27 = smov 128   ;;  %s2233_s20 = smov 8  }
 0x8b2   : > { %1997 = dma.vmem_to_hbm [thread:$0]  (%p2751_p9), %s2670_s18, 256, %s2675_s28, %s2677_s17, %s2232_s27, %s2232_s27, %s2233_s20  }
 0x8b3 PF: > { %s2752_s21 = sld [smem:[#allocation12_spill]]  ;;  %p2009_p2 = scmp.ge.s32.totalorder %s2222_s16, 2 }
 0x8b4   : > { %s1691_s26 = sand.u32 1, %s2210_s29  }
 0x8b5   : > { %s1692_s24 = scalar_lea.sflag [#allocation5], %s1691_s26 }
 0x8b9   : > { %p2753_p3 = scmp.ne.s32.totalorder %s2752_s21, 0 }
 0x8bb   : > { %p2004_p4 = pnand %p2009_p2, %p2753_p3 }
 0x8bd   : > { %2205 = dma.done.wait (!%p2004_p4), %s1692_s24, 256  }
 0x8be   : > { %2207 = vsyncadd (!%p2004_p4), %s1692_s24, 4294967040  ;;  %s2754_s16 = sld [smem:[#allocation10_spill]]  ;;  %s2755_s15 = sld [smem:[#allocation9_spill]] }
 0x8bf   : > { %s2756_s19 = sld [smem:[#allocation11_spill]]  ;;  %s2757_s29 = smov %s2214_s30 }
 0x8c4   : > { %p25_p7 = scmp.ge.s32.totalorder %s2754_s16, 4   ;;  %s2758_s30 = smov %s2755_s15 }
 0x8c5   : > { %s2759_s15 = smov %s2756_s19 }
 0x8c6   :  { %27 = sbr.rel (!%p25_p7) target bundleno = 4 (0x4), region = 119 }
 0x8cd   :  { %1697 = vsyncpa [#allocation4], 1 }
 0x8ce   :  { %1699 = vsyncpa [#allocation4 + $0x1], 1 }
 0x8cf   :  { %1700 = vsyncpa [#allocation5], 1 }
 0x8d0   :  { %1702 = vsyncpa [#allocation5 + $0x1], 1 }

</bundles_post_ra>
